<compile_context>
chip_gen: v6e
topology: v6e:2x2x1
jax: 0.10.0
libtpu: 0.0.40
codegen_flags: <defaults>
</compile_context>

<pallas_src>
import functools

import jax
import jax.numpy as jnp
from jax import lax
from jax.experimental import pallas as pl
from jax.experimental.pallas import tpu as pltpu

HIDDEN = 200
HIDDEN_PAD = 256          # 200 -> 256 (multiple of 128 lanes)
NUM_CLASSES = 10
OUT_PAD = 128             # 10 -> 128 (lane-dense output stores)


def _round_up(x, m):
    return (x + m - 1) // m * m


def mnist_mlp_kernel(x_ref, w1_ref, b1_ref, w2_ref, b2_ref, w3_ref, b3_ref,
                     o_ref, *, num_classes):
    # x:  (TB, size) f32 (cast to bf16 on-chip)
    # w1: (size, 256) bf16    b1: (1, 256) f32
    # w2: (256, 256) bf16     b2: (1, 256) f32
    # w3: (256, 128) bf16     b3: (1, 128) f32
    # o:  (TB, 128) bf16
    x = x_ref[...].astype(jnp.bfloat16)

    # Layer 1: bf16 MXU matmul, f32 accumulate, f32 bias + ReLU.
    h1 = jnp.dot(x, w1_ref[...], preferred_element_type=jnp.float32) + b1_ref[...]
    h1 = jnp.maximum(h1, 0.0).astype(jnp.bfloat16)

    # Layer 2.
    h2 = jnp.dot(h1, w2_ref[...], preferred_element_type=jnp.float32) + b2_ref[...]
    h2 = jnp.maximum(h2, 0.0).astype(jnp.bfloat16)

    # Layer 3 (padded to 128 output lanes).
    logits = jnp.dot(h2, w3_ref[...], preferred_element_type=jnp.float32) + b3_ref[...]

    # Mask padded lanes to -inf so the log-sum-exp only covers the real classes.
    col = lax.broadcasted_iota(jnp.int32, logits.shape, dimension=1)
    logits = jnp.where(col < num_classes, logits, -jnp.inf)

    # Numerically-stable log_softmax over the last axis (XLU reduce + EUP exp/log).
    m = jnp.max(logits, axis=-1, keepdims=True)
    shifted = logits - m
    lse = jnp.log(jnp.sum(jnp.exp(shifted), axis=-1, keepdims=True))
    o_ref[...] = (shifted - lse).astype(o_ref.dtype)


def prepare_params(params):
    """One-time weight prep: transpose to (in, out), zero-pad only the OUTPUT
    dims (hidden -> 256, logits -> 128), cast matmul weights to bf16.  Biases
    stay f32 (added after the f32 accumulation).  The K (feature) dim of x/w1
    is left un-padded so x needs no wrapper-side pad pass."""
    size = params["w1"].shape[1]

    def pad2(a, rows, cols):
        return jnp.pad(a, ((0, rows - a.shape[0]), (0, cols - a.shape[1])))

    def pad1(a, cols):
        return jnp.pad(a, (0, cols - a.shape[0])).reshape(1, -1)

    w1 = params["w1"].astype(jnp.float32).T   # (size, 200)
    w2 = params["w2"].astype(jnp.float32).T   # (200, 200)
    w3 = params["w3"].astype(jnp.float32).T   # (200, 10)

    return {
        "size": size,
        "w1": pad2(w1, size, HIDDEN_PAD).astype(jnp.bfloat16),         # (size, 256)
        "b1": pad1(params["b1"].astype(jnp.float32), HIDDEN_PAD),
        "w2": pad2(w2, HIDDEN_PAD, HIDDEN_PAD).astype(jnp.bfloat16),   # (256, 256)
        "b2": pad1(params["b2"].astype(jnp.float32), HIDDEN_PAD),
        "w3": pad2(w3, HIDDEN_PAD, OUT_PAD).astype(jnp.bfloat16),      # (256, 128)
        "b3": pad1(params["b3"].astype(jnp.float32), OUT_PAD),
    }


def mnist_model_forward(x_nchw, prepped, *, batch_tile=512):
    """x_nchw: (B, C, H, W); prepped: output of prepare_params.
    Returns (rows, 10) bf16 log-probs (rows = B*C*H*W // size, as in x.view(-1, size))."""
    size = prepped["size"]

    # PyTorch x.view(-1, size): contiguous reshape -> metadata-only, no HBM pass.
    x2d = x_nchw.reshape(-1, size)
    rows = x2d.shape[0]

    # Batch tile selection:
    #  * rows >= 2*batch_tile: use batch_tile (>= 4-8 grid steps at real batch
    #    sizes -> good pipelining and v7x megacore split).
    #  * batch_tile <= rows < 2*batch_tile: split into 2 balanced tiles so both
    #    v7x TensorCores get work.
    #  * small batches: one tile rounded up to 16 rows (clean bf16 row packing).
    if rows >= 2 * batch_tile:
        TB = batch_tile
    elif rows >= batch_tile:
        TB = _round_up(pl.cdiv(rows, 2), 16)
    else:
        TB = _round_up(max(rows, 1), 16)

    grid = (pl.cdiv(rows, TB),)

    kernel = functools.partial(mnist_mlp_kernel, num_classes=NUM_CLASSES)

    flops = 2 * rows * (size * HIDDEN_PAD + HIDDEN_PAD * HIDDEN_PAD + HIDDEN_PAD * OUT_PAD)
    bytes_accessed = (
        rows * size * 4                                                     # x read (f32)
        + (prepped["w1"].size + prepped["w2"].size + prepped["w3"].size) * 2
        + (prepped["b1"].size + prepped["b2"].size + prepped["b3"].size) * 4
        + rows * OUT_PAD * 2                                                # bf16 store
    )

    compiler_kwargs = dict(dimension_semantics=("parallel",))
    if TB >= 2048:
        # v5e's default scoped VMEM is 16 MiB; very large batch tiles need an
        # explicit limit even though physical VMEM is fine.
        compiler_kwargs["vmem_limit_bytes"] = 32 * 1024 * 1024

    def run(weight_buffers):
        def wspec(shape):
            # Resident blocks (constant index_map) never re-fetch; single-buffer
            # them so default double-buffering doesn't waste VMEM.
            if weight_buffers is None:
                return pl.BlockSpec(shape, lambda i: (0, 0))
            return pl.BlockSpec(shape, lambda i: (0, 0),
                                pipeline_mode=pl.Buffered(weight_buffers))

        return pl.pallas_call(
            kernel,
            out_shape=jax.ShapeDtypeStruct((rows, OUT_PAD), jnp.bfloat16),
            grid_spec=pltpu.PrefetchScalarGridSpec(
                num_scalar_prefetch=0,
                grid=grid,
                in_specs=[
                    pl.BlockSpec((TB, size), lambda i: (i, 0)),   # x tile (full K dim)
                    wspec((size, HIDDEN_PAD)),                    # w1 (resident)
                    wspec((1, HIDDEN_PAD)),                       # b1
                    wspec((HIDDEN_PAD, HIDDEN_PAD)),              # w2
                    wspec((1, HIDDEN_PAD)),                       # b2
                    wspec((HIDDEN_PAD, OUT_PAD)),                 # w3
                    wspec((1, OUT_PAD)),                          # b3
                ],
                out_specs=pl.BlockSpec((TB, OUT_PAD), lambda i: (i, 0)),
            ),
            compiler_params=pltpu.CompilerParams(**compiler_kwargs),
            cost_estimate=pl.CostEstimate(
                flops=flops,
                transcendentals=rows * (OUT_PAD + 1),
                bytes_accessed=bytes_accessed,
            ),
        )(x2d, prepped["w1"], prepped["b1"], prepped["w2"], prepped["b2"],
          prepped["w3"], prepped["b3"])

    try:
        out_pad = run(1)            # single-buffered resident weights/biases
    except Exception:               # pipeline_mode / Buffered(1) unsupported
        out_pad = run(None)         # fall back to default (double) buffering

    # Tiny lane slice (padded logit lanes dropped); consumer fuses any f32 cast.
    return out_pad[:, :NUM_CLASSES]


def init_params(key, width, height):
    """Deterministic synthetic params with PyTorch nn.Linear shapes/init range."""
    size = width * height
    k = jax.random.split(key, 6)

    def uinit(kk, shape, fan_in):
        bound = 1.0 / jnp.sqrt(fan_in)
        return jax.random.uniform(kk, shape, jnp.float32, -bound, bound)

    return {
        "w1": uinit(k[0], (HIDDEN, size), size),
        "b1": uinit(k[1], (HIDDEN,), size),
        "w2": uinit(k[2], (HIDDEN, HIDDEN), HIDDEN),
        "b2": uinit(k[3], (HIDDEN,), HIDDEN),
        "w3": uinit(k[4], (NUM_CLASSES, HIDDEN), HIDDEN),
        "b3": uinit(k[5], (NUM_CLASSES,), HIDDEN),
    }


if __name__ == "__main__":
    key = jax.random.PRNGKey(0)
    kp, kx = jax.random.split(key)

    # Small shapes consistent with the module: width=height=16 -> size=256, batch=2.
    B, C, H, W = 2, 1, 16, 16
    params = init_params(kp, W, H)
    x = jax.random.normal(kx, (B, C, H, W), jnp.float32)

    prepped = prepare_params(params)
    out = mnist_model_forward(x, prepped)
    out = jax.block_until_ready(out)

    # Pure-JAX f32 reference of the original forward.
    x2d = x.reshape(-1, W * H)
    h1 = jnp.maximum(x2d @ params["w1"].T + params["b1"], 0.0)
    h2 = jnp.maximum(h1 @ params["w2"].T + params["b2"], 0.0)
    ref = jax.nn.log_softmax(h2 @ params["w3"].T + params["b3"], axis=-1)

    assert out.shape == (B, NUM_CLASSES)
    out_f32 = out.astype(jnp.float32)
    row_sums = jnp.sum(jnp.exp(out_f32), axis=1)
    assert bool(jnp.all(jnp.abs(row_sums - 1.0) < 2e-2))   # bf16-output tolerance
    assert bool(jnp.max(jnp.abs(out_f32 - ref)) < 5e-2)    # bf16 matmul/store tolerance

    print("KERNEL_OK")
</pallas_src>

<mosaic_0001>
module attributes {stable_mosaic.version = 11 : i64} {
  func.func @mnist_mlp_kernel(%arg0: i32, %arg1: memref<16x256xf32, #tpu.memory_space<vmem>>, %arg2: memref<256x256xbf16, #tpu.memory_space<vmem>>, %arg3: memref<1x256xf32, #tpu.memory_space<vmem>>, %arg4: memref<256x256xbf16, #tpu.memory_space<vmem>>, %arg5: memref<1x256xf32, #tpu.memory_space<vmem>>, %arg6: memref<256x128xbf16, #tpu.memory_space<vmem>>, %arg7: memref<1x128xf32, #tpu.memory_space<vmem>>, %arg8: memref<16x128xbf16, #tpu.memory_space<vmem>>) attributes {dimension_semantics = [#tpu.dimension_semantics<parallel>], iteration_bounds = array<i64: 1>, scalar_prefetch = 0 : i64, scratch_operands = 0 : i64, tpu.core_type = #tpu.core_type<tc>, window_params = [{transform_indices = @transform_0, window_bounds = array<i64: 16, 256>}, {pipeline_mode = #tpu.pipeline_mode<synchronous>, transform_indices = @transform_1, window_bounds = array<i64: 256, 256>}, {pipeline_mode = #tpu.pipeline_mode<synchronous>, transform_indices = @transform_2, window_bounds = array<i64: 1, 256>}, {pipeline_mode = #tpu.pipeline_mode<synchronous>, transform_indices = @transform_3, window_bounds = array<i64: 256, 256>}, {pipeline_mode = #tpu.pipeline_mode<synchronous>, transform_indices = @transform_4, window_bounds = array<i64: 1, 256>}, {pipeline_mode = #tpu.pipeline_mode<synchronous>, transform_indices = @transform_5, window_bounds = array<i64: 256, 128>}, {pipeline_mode = #tpu.pipeline_mode<synchronous>, transform_indices = @transform_6, window_bounds = array<i64: 1, 128>}, {transform_indices = @transform_7, window_bounds = array<i64: 16, 128>}]} {
    %c0 = arith.constant 0 : index
    %c0_0 = arith.constant 0 : index
    %0 = vector.load %arg1[%c0, %c0_0] : memref<16x256xf32, #tpu.memory_space<vmem>>, vector<16x256xf32>
    %1 = arith.truncf %0 : vector<16x256xf32> to vector<16x256xbf16>
    %c0_1 = arith.constant 0 : index
    %c0_2 = arith.constant 0 : index
    %2 = vector.load %arg2[%c0_1, %c0_2] : memref<256x256xbf16, #tpu.memory_space<vmem>>, vector<256x256xbf16>
    %cst = arith.constant dense<0.000000e+00> : vector<16x256xf32>
    %3 = tpu.matmul %1, %2, %cst {dimension_numbers = #tpu.dot_dimension_numbers<[1], [0], [0], [1], [0, 0, 1, 1], [], []>} : vector<16x256xbf16>, vector<256x256xbf16>, vector<16x256xf32> -> vector<16x256xf32>
    %c0_3 = arith.constant 0 : index
    %c0_4 = arith.constant 0 : index
    %4 = vector.load %arg3[%c0_3, %c0_4] : memref<1x256xf32, #tpu.memory_space<vmem>>, vector<1x256xf32>
    %5 = vector.broadcast %4 : vector<1x256xf32> to vector<16x256xf32>
    %6 = arith.addf %3, %5 : vector<16x256xf32>
    %cst_5 = arith.constant 0.000000e+00 : f32
    %7 = vector.broadcast %cst_5 : f32 to vector<16x256xf32>
    %8 = arith.maximumf %6, %7 : vector<16x256xf32>
    %9 = arith.truncf %8 : vector<16x256xf32> to vector<16x256xbf16>
    %c0_6 = arith.constant 0 : index
    %c0_7 = arith.constant 0 : index
    %10 = vector.load %arg4[%c0_6, %c0_7] : memref<256x256xbf16, #tpu.memory_space<vmem>>, vector<256x256xbf16>
    %cst_8 = arith.constant dense<0.000000e+00> : vector<16x256xf32>
    %11 = tpu.matmul %9, %10, %cst_8 {dimension_numbers = #tpu.dot_dimension_numbers<[1], [0], [0], [1], [0, 0, 1, 1], [], []>} : vector<16x256xbf16>, vector<256x256xbf16>, vector<16x256xf32> -> vector<16x256xf32>
    %c0_9 = arith.constant 0 : index
    %c0_10 = arith.constant 0 : index
    %12 = vector.load %arg5[%c0_9, %c0_10] : memref<1x256xf32, #tpu.memory_space<vmem>>, vector<1x256xf32>
    %13 = vector.broadcast %12 : vector<1x256xf32> to vector<16x256xf32>
    %14 = arith.addf %11, %13 : vector<16x256xf32>
    %cst_11 = arith.constant 0.000000e+00 : f32
    %15 = vector.broadcast %cst_11 : f32 to vector<16x256xf32>
    %16 = arith.maximumf %14, %15 : vector<16x256xf32>
    %17 = arith.truncf %16 : vector<16x256xf32> to vector<16x256xbf16>
    %c0_12 = arith.constant 0 : index
    %c0_13 = arith.constant 0 : index
    %18 = vector.load %arg6[%c0_12, %c0_13] : memref<256x128xbf16, #tpu.memory_space<vmem>>, vector<256x128xbf16>
    %cst_14 = arith.constant dense<0.000000e+00> : vector<16x128xf32>
    %19 = tpu.matmul %17, %18, %cst_14 {dimension_numbers = #tpu.dot_dimension_numbers<[1], [0], [0], [1], [0, 0, 1, 1], [], []>} : vector<16x256xbf16>, vector<256x128xbf16>, vector<16x128xf32> -> vector<16x128xf32>
    %c0_15 = arith.constant 0 : index
    %c0_16 = arith.constant 0 : index
    %20 = vector.load %arg7[%c0_15, %c0_16] : memref<1x128xf32, #tpu.memory_space<vmem>>, vector<1x128xf32>
    %21 = vector.broadcast %20 : vector<1x128xf32> to vector<16x128xf32>
    %22 = arith.addf %19, %21 : vector<16x128xf32>
    %23 = tpu.iota {dimensions = array<i32: 1>} : vector<16x128xi32>
    %c10_i32 = arith.constant 10 : i32
    %24 = vector.broadcast %c10_i32 : i32 to vector<16x128xi32>
    %25 = arith.cmpi slt, %23, %24 : vector<16x128xi32>
    %cst_17 = arith.constant 0xFF800000 : f32
    %26 = vector.broadcast %cst_17 : f32 to vector<16x128xf32>
    %27 = arith.select %25, %22, %26 : vector<16x128xi1>, vector<16x128xf32>
    %cst_18 = arith.constant dense<0xFF800000> : vector<16xf32>
    %28 = vector.multi_reduction <maximumf>, %27, %cst_18 [1] : vector<16x128xf32> to vector<16xf32>
    %29 = vector.shape_cast %28 : vector<16xf32> to vector<16x1xf32>
    %30 = vector.broadcast %29 : vector<16x1xf32> to vector<16x128xf32>
    %31 = arith.subf %27, %30 : vector<16x128xf32>
    %32 = math.exp %31 : vector<16x128xf32>
    %cst_19 = arith.constant dense<0.000000e+00> : vector<16xf32>
    %33 = vector.multi_reduction <add>, %32, %cst_19 [1] : vector<16x128xf32> to vector<16xf32>
    %34 = vector.shape_cast %33 : vector<16xf32> to vector<16x1xf32>
    %35 = math.log %34 : vector<16x1xf32>
    %36 = vector.broadcast %35 : vector<16x1xf32> to vector<16x128xf32>
    %37 = arith.subf %31, %36 : vector<16x128xf32>
    %38 = arith.truncf %37 : vector<16x128xf32> to vector<16x128xbf16>
    %c0_20 = arith.constant 0 : index
    %c0_21 = arith.constant 0 : index
    %39 = vector.load %arg8[%c0_20, %c0_21] : memref<16x128xbf16, #tpu.memory_space<vmem>>, vector<16x128xbf16>
    tpu.vector_store %arg8[%c0_20, %c0_21], %38 {strides = array<i32>} : memref<16x128xbf16, #tpu.memory_space<vmem>>, vector<16x128xbf16>,
    return
  }
  func.func @transform_0(%arg0: i32) -> (i32, i32) {
    %c0_i32 = arith.constant 0 : i32
    %c0_i32_0 = arith.constant 0 : i32
    return %arg0, %c0_i32 : i32, i32
  }
  func.func @transform_1(%arg0: i32) -> (i32, i32) {
    %c0_i32 = arith.constant 0 : i32
    %c0_i32_0 = arith.constant 0 : i32
    %c0_i32_1 = arith.constant 0 : i32
    return %c0_i32, %c0_i32_0 : i32, i32
  }
  func.func @transform_2(%arg0: i32) -> (i32, i32) {
    %c0_i32 = arith.constant 0 : i32
    %c0_i32_0 = arith.constant 0 : i32
    %c0_i32_1 = arith.constant 0 : i32
    return %c0_i32, %c0_i32_0 : i32, i32
  }
  func.func @transform_3(%arg0: i32) -> (i32, i32) {
    %c0_i32 = arith.constant 0 : i32
    %c0_i32_0 = arith.constant 0 : i32
    %c0_i32_1 = arith.constant 0 : i32
    return %c0_i32, %c0_i32_0 : i32, i32
  }
  func.func @transform_4(%arg0: i32) -> (i32, i32) {
    %c0_i32 = arith.constant 0 : i32
    %c0_i32_0 = arith.constant 0 : i32
    %c0_i32_1 = arith.constant 0 : i32
    return %c0_i32, %c0_i32_0 : i32, i32
  }
  func.func @transform_5(%arg0: i32) -> (i32, i32) {
    %c0_i32 = arith.constant 0 : i32
    %c0_i32_0 = arith.constant 0 : i32
    %c0_i32_1 = arith.constant 0 : i32
    return %c0_i32, %c0_i32_0 : i32, i32
  }
  func.func @transform_6(%arg0: i32) -> (i32, i32) {
    %c0_i32 = arith.constant 0 : i32
    %c0_i32_0 = arith.constant 0 : i32
    %c0_i32_1 = arith.constant 0 : i32
    return %c0_i32, %c0_i32_0 : i32, i32
  }
  func.func @transform_7(%arg0: i32) -> (i32, i32) {
    %c0_i32 = arith.constant 0 : i32
    %c0_i32_0 = arith.constant 0 : i32
    return %arg0, %c0_i32 : i32, i32
  }
}

module attributes {stable_mosaic.version = 11 : i64} {
  func.func @mnist_mlp_kernel(%arg0: i32, %arg1: memref<16x256xf32, #tpu.memory_space<vmem>>, %arg2: memref<256x256xbf16, #tpu.memory_space<vmem>>, %arg3: memref<1x256xf32, #tpu.memory_space<vmem>>, %arg4: memref<256x256xbf16, #tpu.memory_space<vmem>>, %arg5: memref<1x256xf32, #tpu.memory_space<vmem>>, %arg6: memref<256x128xbf16, #tpu.memory_space<vmem>>, %arg7: memref<1x128xf32, #tpu.memory_space<vmem>>, %arg8: memref<16x128xbf16, #tpu.memory_space<vmem>>) attributes {dimension_semantics = [#tpu.dimension_semantics<parallel>], iteration_bounds = array<i64: 1>, scalar_prefetch = 0 : i64, scratch_operands = 0 : i64, tpu.core_type = #tpu.core_type<tc>, window_params = [{transform_indices = @transform_0, window_bounds = array<i64: 16, 256>}, {pipeline_mode = #tpu.pipeline_mode<synchronous>, transform_indices = @transform_1, window_bounds = array<i64: 256, 256>}, {pipeline_mode = #tpu.pipeline_mode<synchronous>, transform_indices = @transform_2, window_bounds = array<i64: 1, 256>}, {pipeline_mode = #tpu.pipeline_mode<synchronous>, transform_indices = @transform_3, window_bounds = array<i64: 256, 256>}, {pipeline_mode = #tpu.pipeline_mode<synchronous>, transform_indices = @transform_4, window_bounds = array<i64: 1, 256>}, {pipeline_mode = #tpu.pipeline_mode<synchronous>, transform_indices = @transform_5, window_bounds = array<i64: 256, 128>}, {pipeline_mode = #tpu.pipeline_mode<synchronous>, transform_indices = @transform_6, window_bounds = array<i64: 1, 128>}, {transform_indices = @transform_7, window_bounds = array<i64: 16, 128>}]} {
    %c0 = arith.constant 0 : index
    %c0_0 = arith.constant 0 : index
    %0 = vector.load %arg1[%c0, %c0_0] : memref<16x256xf32, #tpu.memory_space<vmem>>, vector<16x256xf32>
    %1 = arith.truncf %0 : vector<16x256xf32> to vector<16x256xbf16>
    %c0_1 = arith.constant 0 : index
    %c0_2 = arith.constant 0 : index
    %2 = vector.load %arg2[%c0_1, %c0_2] : memref<256x256xbf16, #tpu.memory_space<vmem>>, vector<256x256xbf16>
    %cst = arith.constant dense<0.000000e+00> : vector<16x256xf32>
    %3 = tpu.matmul %1, %2, %cst {dimension_numbers = #tpu.dot_dimension_numbers<[1], [0], [0], [1], [0, 0, 1, 1], [], []>} : vector<16x256xbf16>, vector<256x256xbf16>, vector<16x256xf32> -> vector<16x256xf32>
    %c0_3 = arith.constant 0 : index
    %c0_4 = arith.constant 0 : index
    %4 = vector.load %arg3[%c0_3, %c0_4] : memref<1x256xf32, #tpu.memory_space<vmem>>, vector<1x256xf32>
    %5 = vector.broadcast %4 : vector<1x256xf32> to vector<16x256xf32>
    %6 = arith.addf %3, %5 : vector<16x256xf32>
    %cst_5 = arith.constant 0.000000e+00 : f32
    %7 = vector.broadcast %cst_5 : f32 to vector<16x256xf32>
    %8 = arith.maximumf %6, %7 : vector<16x256xf32>
    %9 = arith.truncf %8 : vector<16x256xf32> to vector<16x256xbf16>
    %c0_6 = arith.constant 0 : index
    %c0_7 = arith.constant 0 : index
    %10 = vector.load %arg4[%c0_6, %c0_7] : memref<256x256xbf16, #tpu.memory_space<vmem>>, vector<256x256xbf16>
    %cst_8 = arith.constant dense<0.000000e+00> : vector<16x256xf32>
    %11 = tpu.matmul %9, %10, %cst_8 {dimension_numbers = #tpu.dot_dimension_numbers<[1], [0], [0], [1], [0, 0, 1, 1], [], []>} : vector<16x256xbf16>, vector<256x256xbf16>, vector<16x256xf32> -> vector<16x256xf32>
    %c0_9 = arith.constant 0 : index
    %c0_10 = arith.constant 0 : index
    %12 = vector.load %arg5[%c0_9, %c0_10] : memref<1x256xf32, #tpu.memory_space<vmem>>, vector<1x256xf32>
    %13 = vector.broadcast %12 : vector<1x256xf32> to vector<16x256xf32>
    %14 = arith.addf %11, %13 : vector<16x256xf32>
    %cst_11 = arith.constant 0.000000e+00 : f32
    %15 = vector.broadcast %cst_11 : f32 to vector<16x256xf32>
    %16 = arith.maximumf %14, %15 : vector<16x256xf32>
    %17 = arith.truncf %16 : vector<16x256xf32> to vector<16x256xbf16>
    %c0_12 = arith.constant 0 : index
    %c0_13 = arith.constant 0 : index
    %18 = vector.load %arg6[%c0_12, %c0_13] : memref<256x128xbf16, #tpu.memory_space<vmem>>, vector<256x128xbf16>
    %cst_14 = arith.constant dense<0.000000e+00> : vector<16x128xf32>
    %19 = tpu.matmul %17, %18, %cst_14 {dimension_numbers = #tpu.dot_dimension_numbers<[1], [0], [0], [1], [0, 0, 1, 1], [], []>} : vector<16x256xbf16>, vector<256x128xbf16>, vector<16x128xf32> -> vector<16x128xf32>
    %c0_15 = arith.constant 0 : index
    %c0_16 = arith.constant 0 : index
    %20 = vector.load %arg7[%c0_15, %c0_16] : memref<1x128xf32, #tpu.memory_space<vmem>>, vector<1x128xf32>
    %21 = vector.broadcast %20 : vector<1x128xf32> to vector<16x128xf32>
    %22 = arith.addf %19, %21 : vector<16x128xf32>
    %23 = tpu.iota {dimensions = array<i32: 1>} : vector<16x128xi32>
    %c10_i32 = arith.constant 10 : i32
    %24 = vector.broadcast %c10_i32 : i32 to vector<16x128xi32>
    %25 = arith.cmpi slt, %23, %24 : vector<16x128xi32>
    %cst_17 = arith.constant 0xFF800000 : f32
    %26 = vector.broadcast %cst_17 : f32 to vector<16x128xf32>
    %27 = arith.select %25, %22, %26 : vector<16x128xi1>, vector<16x128xf32>
    %cst_18 = arith.constant dense<0xFF800000> : vector<16xf32>
    %28 = vector.multi_reduction <maximumf>, %27, %cst_18 [1] : vector<16x128xf32> to vector<16xf32>
    %29 = vector.shape_cast %28 : vector<16xf32> to vector<16x1xf32>
    %30 = vector.broadcast %29 : vector<16x1xf32> to vector<16x128xf32>
    %31 = arith.subf %27, %30 : vector<16x128xf32>
    %32 = math.exp %31 : vector<16x128xf32>
    %cst_19 = arith.constant dense<0.000000e+00> : vector<16xf32>
    %33 = vector.multi_reduction <add>, %32, %cst_19 [1] : vector<16x128xf32> to vector<16xf32>
    %34 = vector.shape_cast %33 : vector<16xf32> to vector<16x1xf32>
    %35 = math.log %34 : vector<16x1xf32>
    %36 = vector.broadcast %35 : vector<16x1xf32> to vector<16x128xf32>
    %37 = arith.subf %31, %36 : vector<16x128xf32>
    %38 = arith.truncf %37 : vector<16x128xf32> to vector<16x128xbf16>
    %c0_20 = arith.constant 0 : index
    %c0_21 = arith.constant 0 : index
    %39 = vector.load %arg8[%c0_20, %c0_21] : memref<16x128xbf16, #tpu.memory_space<vmem>>, vector<16x128xbf16>
    tpu.vector_store %arg8[%c0_20, %c0_21], %38 {strides = array<i32>} : memref<16x128xbf16, #tpu.memory_space<vmem>>, vector<16x128xbf16>,
    return
  }
  func.func @transform_0(%arg0: i32) -> (i32, i32) {
    %c0_i32 = arith.constant 0 : i32
    %c0_i32_0 = arith.constant 0 : i32
    return %arg0, %c0_i32 : i32, i32
  }
  func.func @transform_1(%arg0: i32) -> (i32, i32) {
    %c0_i32 = arith.constant 0 : i32
    %c0_i32_0 = arith.constant 0 : i32
    %c0_i32_1 = arith.constant 0 : i32
    return %c0_i32, %c0_i32_0 : i32, i32
  }
  func.func @transform_2(%arg0: i32) -> (i32, i32) {
    %c0_i32 = arith.constant 0 : i32
    %c0_i32_0 = arith.constant 0 : i32
    %c0_i32_1 = arith.constant 0 : i32
    return %c0_i32, %c0_i32_0 : i32, i32
  }
  func.func @transform_3(%arg0: i32) -> (i32, i32) {
    %c0_i32 = arith.constant 0 : i32
    %c0_i32_0 = arith.constant 0 : i32
    %c0_i32_1 = arith.constant 0 : i32
    return %c0_i32, %c0_i32_0 : i32, i32
  }
  func.func @transform_4(%arg0: i32) -> (i32, i32) {
    %c0_i32 = arith.constant 0 : i32
    %c0_i32_0 = arith.constant 0 : i32
    %c0_i32_1 = arith.constant 0 : i32
    return %c0_i32, %c0_i32_0 : i32, i32
  }
  func.func @transform_5(%arg0: i32) -> (i32, i32) {
    %c0_i32 = arith.constant 0 : i32
    %c0_i32_0 = arith.constant 0 : i32
    %c0_i32_1 = arith.constant 0 : i32
    return %c0_i32, %c0_i32_0 : i32, i32
  }
  func.func @transform_6(%arg0: i32) -> (i32, i32) {
    %c0_i32 = arith.constant 0 : i32
    %c0_i32_0 = arith.constant 0 : i32
    %c0_i32_1 = arith.constant 0 : i32
    return %c0_i32, %c0_i32_0 : i32, i32
  }
  func.func @transform_7(%arg0: i32) -> (i32, i32) {
    %c0_i32 = arith.constant 0 : i32
    %c0_i32_0 = arith.constant 0 : i32
    return %arg0, %c0_i32 : i32, i32
  }
}

</mosaic_0001>

<bundles_post_ra>
// kernel: tpu_custom_call.1
= control target key start
LH: loop header
LB: loop body
LE: loop exit
PB: predicated region body
PF: predicated region fallthrough
CT: control target
= control target key end

     0   :  { %12 = vsyncpa [#allocation3], 0  ;;  %s1396_s0 = inlined_call_operand.hbm [shape: f32[2,256], index: 0, kind: input, shape index: {}]   ;;  %s1397_s1 = inlined_call_operand.hbm [shape: bf16[256,256], index: 1, kind: input, shape index: {}]   ;;  %s1398_s2 = inlined_call_operand.vmem [shape: f32[1,256], index: 2, kind: input, shape index: {}]   ;;  %s1399_s3 = inlined_call_operand.hbm [shape: bf16[256,256], index: 3, kind: input, shape index: {}]   ;;  %s1400_s4 = inlined_call_operand.vmem [shape: f32[1,256], index: 4, kind: input, shape index: {}]   ;;  %s1401_s5 = inlined_call_operand.hbm [shape: bf16[256,128], index: 5, kind: input, shape index: {}]   ;;  %s1402_s6 = inlined_call_operand.vmem [shape: f32[1,128], index: 6, kind: input, shape index: {}]   ;;  %s1403_s7 = inlined_call_operand.hbm [shape: bf16[2,128], index: 7, kind: output, shape index: {}]  }
   0x1   :  { %13 = vsyncpa [#allocation6], 0 }
   0x2   :  { %14 = vsyncpa [#allocation9], 0 }
   0x3   :  { %15 = vsyncpa [#allocation4], 0 }
   0x4   :  { %20 = vsyncadd [#allocation3], 448  ;;  %s1291_s24 = smov [#allocation5]  }
   0x5   :  { %s33_s25 = sshll.u32 %s1291_s24, 4  ;;  %s34_s25 = int_to_ptr.vmem [resolvable:$true] %s33_s25 }
   0x6   :  { %s1191_s26 = scalar_lea.vmem %s34_s25, 4096  ;;  %p1196_p1 = scmp.lt.s32.totalorder %s34_s25, %s34_s25 }
   0x7   :  { %p1192_p0 = scmp.ne.s32.totalorder %s34_s25, %s1191_s26  ;;  %p1197_p2 = scmp.lt.s32.totalorder %s1191_s26, %s1191_s26 }
   0x9   :  { %p1198_p3 = por %p1197_p2, %p1196_p1 }
   0xb   :  { %p1199_p4 = pnand %p1198_p3, %p1192_p0 }
   0xd   :  { %1202 = shalt.err (!%p1199_p4)
}
   0xe   :  { %s1292_s27 = smov 128   ;;  %s1293_s28 = smov 8  }
   0xf   :  { %39 = dma.hbm_to_vmem [thread:$0]  %s1397_s1, 4096, %s34_s25, [#allocation6], %s1292_s27, %s1292_s27, %s1293_s28  }
  0x10   :  { %s1294_s8 = smov [#allocation2]  }
  0x11   :  { %s21_s9 = sshll.u32 %s1294_s8, 4  ;;  %s22_s9 = int_to_ptr.vmem [resolvable:$true] %s21_s9 }
  0x12   :  { %s1211_s10 = scalar_lea.vmem %s22_s9, 64  ;;  %s1215_s11 = scalar_lea.vmem %s22_s9, 512 }
  0x13   :  { %p1212_p5 = scmp.ne.s32.totalorder %s22_s9, %s1211_s10  ;;  %p1216_p6 = scmp.lt.s32.totalorder %s22_s9, %s22_s9 }
  0x14   :  { %p1217_p7 = scmp.lt.s32.totalorder %s1215_s11, %s1211_s10 }
  0x16   :  { %p1218_p8 = por %p1217_p7, %p1216_p6 }
  0x18   :  { %p1219_p9 = pnand %p1218_p8, %p1212_p5 }
  0x1a   :  { %1222 = shalt.err (!%p1219_p9)
}
  0x1b   :  { %s1295_s12 = smov 64   ;;  %s1296_s13 = smov 4  }
  0x1c   :  { %27 = dma.hbm_to_vmem [thread:$0]  %s1396_s0, 64, %s22_s9, [#allocation3], %s1295_s12, %s1295_s12, %s1296_s13  }
  0x1d   :  { %s1297_s16 = smov [#allocation7]   ;;  %s1298_s1 = smov [#allocation8]  }
  0x1e   :  { %s47_s17 = sshll.u32 %s1297_s16, 4  ;;  %s61_s18 = sshll.u32 %s1298_s1, 4  ;;  %s48_s17 = int_to_ptr.vmem [resolvable:$true] %s47_s17  ;;  %s62_s18 = int_to_ptr.vmem [resolvable:$true] %s61_s18 }
  0x1f   :  { %s1231_s19 = scalar_lea.vmem %s48_s17, 4096  ;;  %p1236_p11 = scmp.lt.s32.totalorder %s48_s17, %s48_s17 }
  0x20   :  { %p1232_p10 = scmp.ne.s32.totalorder %s48_s17, %s1231_s19  ;;  %p1237_p12 = scmp.lt.s32.totalorder %s1231_s19, %s1231_s19 }
  0x22   :  { %p1238_p13 = por %p1237_p12, %p1236_p11 }
  0x24   :  { %p1239_p0 = pnand %p1238_p13, %p1232_p10 }
  0x26   :  { %1242 = shalt.err (!%p1239_p0)
}
  0x27   :  { %53 = dma.hbm_to_vmem [thread:$0]  %s1399_s3, 4096, %s48_s17, [#allocation6], %s1292_s27, %s1292_s27, %s1293_s28  }
  0x28   :  { %s1251_s0 = scalar_lea.vmem %s62_s18, 2048  ;;  %p1256_p2 = scmp.lt.s32.totalorder %s62_s18, %s62_s18 }
  0x29   :  { %p1252_p1 = scmp.ne.s32.totalorder %s62_s18, %s1251_s0  ;;  %p1257_p3 = scmp.lt.s32.totalorder %s1251_s0, %s1251_s0 }
  0x2b   :  { %p1258_p4 = por %p1257_p3, %p1256_p2 }
  0x2d   :  { %p1259_p5 = pnand %p1258_p4, %p1252_p1 }
  0x2f   :  { %1262 = shalt.err (!%p1259_p5)
}
  0x30   :  { %67 = dma.hbm_to_vmem [thread:$0]  %s1401_s5, 2048, %s62_s18, [#allocation9], %s1295_s12, %s1295_s12, %s1296_s13  }
  0x31   :  { %1283 = dma.done.wait [#allocation3], 512  }
  0x32   :  { %1284 = vsyncadd [#allocation3], 4294966784 }
  0x33   :  { %1285 = dma.done.wait [#allocation6], 8192  }
  0x34   :  { %1286 = vsyncadd [#allocation6], 4294959104 }
  0x35   :  { %1287 = dma.done.wait [#allocation9], 2048  }
  0x36   :  { %1288 = vsyncadd [#allocation9], 4294965248  ;;  %v1055_v0 = vld [vmem:[#allocation5 + $0x74] ss:$8 sps:$4 sm:$0xff]   ;;  %v1057_v1 = vld [vmem:[#allocation5 + $0x70] ss:$8 sps:$4 sm:$0xff]   ;;  %v104_v9 = vlaneseq }
  0x37   :  { %345 = vmatprep.subr.bf16.mxu0 %v1055_v0  ;;  %v1058_v2 = vld [vmem:[#allocation5 + $0x64] ss:$8 sps:$4 sm:$0xff]   ;;  %v1060_v3 = vld [vmem:[#allocation5 + $0x60] ss:$8 sps:$4 sm:$0xff]   ;;  %v1061_v4 = vld [vmem:[#allocation5 + $0x54] ss:$8 sps:$4 sm:$0xff]  }
  0x38   :  { %346 = vmatpush1.bf16.msra.mxu0 %v1057_v1  ;;  %v1063_v5 = vld [vmem:[#allocation5 + $0x50] ss:$8 sps:$4 sm:$0xff]   ;;  %v1064_v6 = vld [vmem:[#allocation5 + $0x44] ss:$8 sps:$4 sm:$0xff]   ;;  %v1066_v7 = vld [vmem:[#allocation5 + $0x40] ss:$8 sps:$4 sm:$0xff]  }
  0x39   :  { %347 = vmatprep.subr.bf16.mxu0 %v1058_v2  ;;  %v1067_v8 = vld [vmem:[#allocation5 + $0x34] ss:$8 sps:$4 sm:$0xff]   ;;  %v1069_v10 = vld [vmem:[#allocation5 + $0x30] ss:$8 sps:$4 sm:$0xff]   ;;  %v1070_v11 = vld [vmem:[#allocation5 + $0x24] ss:$8 sps:$4 sm:$0xff]  }
  0x3a   :  { %v1362_v12 = vshrl.u32 %v104_v9, 7  ;;  %v1072_v13 = vld [vmem:[#allocation5 + $0x20] ss:$8 sps:$4 sm:$0xff]   ;;  %v1073_v14 = vld [vmem:[#allocation5 + $0x14] ss:$8 sps:$4 sm:$0xff]  }
  0x3b   :  { %v1075_v15 = vld [vmem:[#allocation5 + $0x10] ss:$8 sps:$4 sm:$0xff]   ;;  %v1076_v16 = vld [vmem:[#allocation5 + $0x4] ss:$8 sps:$4 sm:$0xff]   ;;  %v1107_v21 = vld [vmem:[#allocation7 + $0x74] ss:$8 sps:$4 sm:$0xff]  }
  0x3c   :  { %348 = vmatpush1.bf16.msra.mxu0 %v1060_v3  ;;  %v1364_v17 = vld.sshfl [vmem:[#allocation2] sm:$0xff pattern:$0x76325410]  ;;  %v1366_v18 = vld.sshfl [vmem:[#allocation2 + $0x8] sm:$0xff pattern:$0x76325410]  ;;  %598 = vmatprep.subr.bf16.mxu1 %v1107_v21 }
  0x3d   :  { %349 = vmatprep.subr.bf16.mxu0 %v1061_v4  ;;  %v1368_v19 = vld.sshfl [vmem:[#allocation2 + $0x10] sm:$0xff pattern:$0x76325410]  ;;  %v1370_v20 = vld.sshfl [vmem:[#allocation2 + $0x18] sm:$0xff pattern:$0x76325410]  ;;  %v116_v26 = vcombine.high %v1364_v17, %v1366_v18  ;;  %v115_v58 = vcombine.low %v1364_v17, %v1366_v18 }
  0x3e   :  { %v1109_v22 = vld [vmem:[#allocation7 + $0x70] ss:$8 sps:$4 sm:$0xff]   ;;  %v1078_v23 = vld [vmem:[#allocation5] ss:$8 sps:$4 sm:$0xff]   ;;  %v1110_v24 = vld [vmem:[#allocation7 + $0x64] ss:$8 sps:$4 sm:$0xff]   ;;  %v134_v27 = vcombine.high %v1368_v19, %v1370_v20  ;;  %v133_v59 = vcombine.low %v1368_v19, %v1370_v20 }
  0x3f   :  { %v1079_v25 = vld [vmem:[#allocation5 + $0xf4] ss:$8 sps:$4 sm:$0xff]   ;;  %599 = vmatpush1.bf16.msra.mxu1 %v1109_v22  ;;  %v1112_v28 = vld [vmem:[#allocation7 + $0x60] ss:$8 sps:$4 sm:$0xff]   ;;  %v1081_v30 = vld [vmem:[#allocation5 + $0xf0] ss:$8 sps:$4 sm:$0xff]  }
  0x40   :  { %350 = vmatpush1.bf16.msra.mxu0 %v1063_v5  ;;  %600 = vmatprep.subr.bf16.mxu1 %v1110_v24  ;;  %v1113_v29 = vld [vmem:[#allocation7 + $0x54] ss:$8 sps:$4 sm:$0xff]   ;;  %v140_v31 = vpack.c.bf16 %v134_v27, %v116_v26  ;;  %v1082_v32 = vld [vmem:[#allocation5 + $0xe4] ss:$8 sps:$4 sm:$0xff]   ;;  %v1115_v33 = vld [vmem:[#allocation7 + $0x50] ss:$8 sps:$4 sm:$0xff]   ;;  %v139_v63 = vpack.c.bf16 %v133_v59, %v115_v58 }
  0x41   :  { %351 = vmatprep.subr.bf16.mxu0 %v1064_v6  ;;  %v1116_v34 = vld [vmem:[#allocation7 + $0x44] ss:$8 sps:$4 sm:$0xff]   ;;  %v1084_v35 = vld [vmem:[#allocation5 + $0xe0] ss:$8 sps:$4 sm:$0xff]   ;;  %v1085_v36 = vld [vmem:[#allocation5 + $0xd4] ss:$8 sps:$4 sm:$0xff]  }
  0x42   :  { %377 = vmatprep.mubr.bf16.mxu0 %v140_v31  ;;  %v1118_v37 = vld [vmem:[#allocation7 + $0x40] ss:$8 sps:$4 sm:$0xff]   ;;  %v1119_v38 = vld [vmem:[#allocation7 + $0x34] ss:$8 sps:$4 sm:$0xff]   ;;  %v1087_v39 = vld [vmem:[#allocation5 + $0xd0] ss:$8 sps:$4 sm:$0xff]  }
  0x43   :  { %601 = vmatpush1.bf16.msra.mxu1 %v1112_v28  ;;  %v1088_v40 = vld [vmem:[#allocation5 + $0xc4] ss:$8 sps:$4 sm:$0xff]   ;;  %v1121_v41 = vld [vmem:[#allocation7 + $0x30] ss:$8 sps:$4 sm:$0xff]   ;;  %v1090_v42 = vld [vmem:[#allocation5 + $0xc0] ss:$8 sps:$4 sm:$0xff]  }
  0x44   :  { %352 = vmatpush1.bf16.msra.mxu0 %v1066_v7  ;;  %602 = vmatprep.subr.bf16.mxu1 %v1113_v29  ;;  %v1091_v43 = vld [vmem:[#allocation5 + $0xb4] ss:$8 sps:$4 sm:$0xff]   ;;  %v1122_v44 = vld [vmem:[#allocation7 + $0x24] ss:$8 sps:$4 sm:$0xff]   ;;  %v1124_v45 = vld [vmem:[#allocation7 + $0x20] ss:$8 sps:$4 sm:$0xff]  }
  0x45   :  { %353 = vmatprep.subr.bf16.mxu0 %v1067_v8  ;;  %v1125_v46 = vld [vmem:[#allocation7 + $0x14] ss:$8 sps:$4 sm:$0xff]   ;;  %v1093_v47 = vld [vmem:[#allocation5 + $0xb0] ss:$8 sps:$4 sm:$0xff]   ;;  %v1094_v48 = vld [vmem:[#allocation5 + $0xa4] ss:$8 sps:$4 sm:$0xff]  }
  0x46   :  { %v1127_v49 = vld [vmem:[#allocation7 + $0x10] ss:$8 sps:$4 sm:$0xff]   ;;  %v1128_v50 = vld [vmem:[#allocation7 + $0x4] ss:$8 sps:$4 sm:$0xff]   ;;  %v1096_v51 = vld [vmem:[#allocation5 + $0xa0] ss:$8 sps:$4 sm:$0xff]  }
  0x47   :  { %603 = vmatpush1.bf16.msra.mxu1 %v1115_v33  ;;  %v1097_v52 = vld [vmem:[#allocation5 + $0x94] ss:$8 sps:$4 sm:$0xff]   ;;  %v1130_v53 = vld [vmem:[#allocation7] ss:$8 sps:$4 sm:$0xff]   ;;  %v1099_v55 = vld [vmem:[#allocation5 + $0x90] ss:$8 sps:$4 sm:$0xff]  }
  0x48   :  { %354 = vmatpush1.bf16.msra.mxu0 %v1069_v10  ;;  %604 = vmatprep.subr.bf16.mxu1 %v1116_v34  ;;  %v1131_v54 = vld [vmem:[#allocation7 + $0xf4] ss:$8 sps:$4 sm:$0xff]   ;;  %v1100_v56 = vld [vmem:[#allocation5 + $0x84] ss:$8 sps:$4 sm:$0xff]   ;;  %v1133_v57 = vld [vmem:[#allocation7 + $0xf0] ss:$8 sps:$4 sm:$0xff]  }
  0x49   :  { %355 = vmatprep.subr.bf16.mxu0 %v1070_v11  ;;  %v1134_v60 = vld [vmem:[#allocation7 + $0xe4] ss:$8 sps:$4 sm:$0xff]   ;;  %v1102_v61 = vld [vmem:[#allocation5 + $0x80] ss:$8 sps:$4 sm:$0xff]   ;;  %v1137_v0 = vld [vmem:[#allocation7 + $0xd4] ss:$8 sps:$4 sm:$0xff]  }
  0x4a   :  { %v1136_v62 = vld [vmem:[#allocation7 + $0xe0] ss:$8 sps:$4 sm:$0xff]   ;;  %v1139_v1 = vld [vmem:[#allocation7 + $0xd0] ss:$8 sps:$4 sm:$0xff]   ;;  %v1140_v2 = vld [vmem:[#allocation7 + $0xc4] ss:$8 sps:$4 sm:$0xff]  }
  0x4b   :  { %605 = vmatpush1.bf16.msra.mxu1 %v1118_v37  ;;  %v1142_v3 = vld [vmem:[#allocation7 + $0xc0] ss:$8 sps:$4 sm:$0xff]   ;;  %v1143_v4 = vld [vmem:[#allocation7 + $0xb4] ss:$8 sps:$4 sm:$0xff]   ;;  %v1145_v5 = vld [vmem:[#allocation7 + $0xb0] ss:$8 sps:$4 sm:$0xff]  }
  0x4c   :  { %356 = vmatpush1.bf16.msra.mxu0 %v1072_v13  ;;  %606 = vmatprep.subr.bf16.mxu1 %v1119_v38  ;;  %v1146_v6 = vld [vmem:[#allocation7 + $0xa4] ss:$8 sps:$4 sm:$0xff]   ;;  %v1148_v7 = vld [vmem:[#allocation7 + $0xa0] ss:$8 sps:$4 sm:$0xff]   ;;  %v1149_v8 = vld [vmem:[#allocation7 + $0x94] ss:$8 sps:$4 sm:$0xff]  }
  0x4d   :  { %357 = vmatprep.subr.bf16.mxu0 %v1073_v14  ;;  %v1151_v10 = vld [vmem:[#allocation7 + $0x90] ss:$8 sps:$4 sm:$0xff]   ;;  %v1152_v11 = vld [vmem:[#allocation7 + $0x84] ss:$8 sps:$4 sm:$0xff]   ;;  %v1154_v13 = vld [vmem:[#allocation7 + $0x80] ss:$8 sps:$4 sm:$0xff]  }
  0x4e   :  { %v1155_v14 = vld [vmem:[#allocation8 + $0x78] sm:$0xff]   ;;  %v1158_v17 = vld [vmem:[#allocation8 + $0x30] sm:$0xff]   ;;  %v1159_v18 = vld [vmem:[#allocation8 + $0x68] sm:$0xff]   ;;  %v181_v24 = vsub.s32 1, %v1362_v12 }
  0x4f   :  { %607 = vmatpush1.bf16.msra.mxu1 %v1121_v41  ;;  %v1160_v19 = vld [vmem:[#allocation8 + $0x28] sm:$0xff]   ;;  %v1161_v20 = vld [vmem:[#allocation8 + $0x60] sm:$0xff]   ;;  %v1163_v22 = vld [vmem:[#allocation8 + $0x58] sm:$0xff]  }
  0x50   :  { %358 = vmatpush1.bf16.msra.mxu0 %v1075_v15  ;;  %608 = vmatprep.subr.bf16.mxu1 %v1122_v44  ;;  %v1156_v15 = vld [vmem:[#allocation8 + $0x38] sm:$0xff]   ;;  %v1162_v21 = vld [vmem:[#allocation8 + $0x20] sm:$0xff]   ;;  %v1166_v44 = vld [vmem:[#allocation8 + $0x10] sm:$0xff]  }
  0x51   :  { %359 = vmatprep.subr.bf16.mxu0 %v1076_v16  ;;  %v1157_v16 = vld [vmem:[#allocation8 + $0x70] sm:$0xff]   ;;  %v173_v26 = vld [vmem:[%s1398_s2] sm:$0x3] }
  0x52   :  { %v182_v28 = vrot.slane %v173_v26, %v181_v24 }
  0x53   :  { %609 = vmatpush1.bf16.msra.mxu1 %v1124_v45  ;;  %v1167_v45 = vld [vmem:[#allocation8 + $0x48] sm:$0xff]  }
  0x54   :  { %360 = vmatpush1.bf16.msra.mxu0 %v1078_v23  ;;  %610 = vmatprep.subr.bf16.mxu1 %v1125_v46  ;;  %v1164_v23 = vld [vmem:[#allocation8 + $0x18] sm:$0xff]   ;;  %v1168_v46 = vld [vmem:[#allocation8 + $0x8] sm:$0xff]  }
  0x55   :  { %361 = vmatprep.subr.bf16.mxu0 %v1079_v25  ;;  %v177_v25 = vsub.s32 0, %v1362_v12 }
  0x57   :  { %611 = vmatpush1.bf16.msra.mxu1 %v1127_v49  ;;  %v178_v29 = vrot.slane %v173_v26, %v177_v25  ;;  %v426_v49 = vld [vmem:[%s1400_s4] sm:$0x3] }
  0x58   :  { %362 = vmatpush2.bf16.msra.mxu0 %v1081_v30  ;;  %612 = vmatprep.subr.bf16.mxu1 %v1128_v50 }
  0x59   :  { %363 = vmatprep.subr.bf16.mxu0 %v1082_v32 }
  0x5b   :  { %613 = vmatpush1.bf16.msra.mxu1 %v1130_v53 }
  0x5c   :  { %364 = vmatpush2.bf16.msra.mxu0 %v1084_v35  ;;  %614 = vmatprep.subr.bf16.mxu1 %v1131_v54 }
  0x5d   :  { %365 = vmatprep.subr.bf16.mxu0 %v1085_v36 }
  0x5f   :  { %615 = vmatpush2.bf16.msra.mxu1 %v1133_v57 }
  0x60   :  { %366 = vmatpush2.bf16.msra.mxu0 %v1087_v39  ;;  %616 = vmatprep.subr.bf16.mxu1 %v1134_v60 }
  0x61   :  { %367 = vmatprep.subr.bf16.mxu0 %v1088_v40 }
  0x63   :  { %617 = vmatpush2.bf16.msra.mxu1 %v1136_v62 }
  0x64   :  { %368 = vmatpush2.bf16.msra.mxu0 %v1090_v42  ;;  %618 = vmatprep.subr.bf16.mxu1 %v1137_v0 }
  0x65   :  { %369 = vmatprep.subr.bf16.mxu0 %v1091_v43  ;;  %v1165_v43 = vld [vmem:[#allocation8 + $0x50] sm:$0xff]  }
  0x67   :  { %619 = vmatpush2.bf16.msra.mxu1 %v1139_v1 }
  0x68   :  { %370 = vmatpush2.bf16.msra.mxu0 %v1093_v47  ;;  %620 = vmatprep.subr.bf16.mxu1 %v1140_v2  ;;  %v1169_v47 = vld [vmem:[#allocation8 + $0x40] sm:$0xff]  }
  0x69   :  { %371 = vmatprep.subr.bf16.mxu0 %v1094_v48  ;;  %v1170_v48 = vld [vmem:[#allocation8] sm:$0xff]  }
  0x6b   :  { %621 = vmatpush2.bf16.msra.mxu1 %v1142_v3  ;;  %v824_v3 = vand.u32 127, %v104_v9 }
  0x6c   :  { %372 = vmatpush2.bf16.msra.mxu0 %v1096_v51  ;;  %622 = vmatprep.subr.bf16.mxu1 %v1143_v4  ;;  %v435_v51 = vrot.slane %v426_v49, %v181_v24 }
  0x6d   :  { %373 = vmatprep.subr.bf16.mxu0 %v1097_v52  ;;  %v431_v52 = vrot.slane %v426_v49, %v177_v25  ;;  %vm825_vm0 = vcmp.lt.s32.totalorder %v824_v3, 10  ;;  %v1299_v25 = vmov 1966171168  }
  0x6e   :  { %v852_v26 = vunpack.c.l.s4 %v1299_v25 }
  0x6f   :  { %623 = vmatpush2.bf16.msra.mxu1 %v1145_v5  ;;  %v998_v5 = vld [vmem:[%s1402_s6] ss:$0 sm:$0xff] }
  0x70   :  { %374 = vmatpush2.bf16.msra.mxu0 %v1099_v55  ;;  %624 = vmatprep.subr.bf16.mxu1 %v1146_v6 }
  0x71   :  { %375 = vmatprep.subr.bf16.mxu0 %v1100_v56 }
  0x73   :  { %625 = vmatpush2.bf16.msra.mxu1 %v1148_v7 }
  0x74   :  { %376 = vmatpush2.bf16.msra.mxu0 %v1102_v61  ;;  %626 = vmatprep.subr.bf16.mxu1 %v1149_v8 }
  0x75   :  { %1020 = vmatprep.subr.bf16.mxu0 %v1155_v14 }
  0x77   :  { %378 = vmatmul.mubr.bf16.vlgmr.msra.gmra.mxu0 %v139_v63  ;;  %627 = vmatpush2.bf16.msra.mxu1 %v1151_v10 }
  0x78   :  { %628 = vmatprep.subr.bf16.mxu1 %v1152_v11  ;;  %1021 = vmatpush3.bf16.msra.mxu0 %v1156_v15 }
  0x79   :  { %1022 = vmatprep.subr.bf16.mxu0 %v1157_v16 }
  0x7b   :  { %629 = vmatpush2.bf16.msra.mxu1 %v1154_v13 }
  0x7c   :  { %1023 = vmatpush3.bf16.msra.mxu0 %v1158_v17 }
  0x7d   :  { %1024 = vmatprep.subr.bf16.mxu0 %v1159_v18 }
  0x80   :  { %1025 = vmatpush3.bf16.msra.mxu0 %v1160_v19 }
  0x81   :  { %1026 = vmatprep.subr.bf16.mxu0 %v1161_v20 }
  0x84   :  { %1027 = vmatpush3.bf16.msra.mxu0 %v1162_v21 }
  0x85   :  { %1028 = vmatprep.subr.bf16.mxu0 %v1163_v22 }
  0x88   :  { %1029 = vmatpush3.bf16.msra.mxu0 %v1164_v23 }
  0x89   :  { %1030 = vmatprep.subr.bf16.mxu0 %v1165_v43 }
  0x8c   :  { %1031 = vmatpush3.bf16.msra.mxu0 %v1166_v44 }
  0x8d   :  { %1032 = vmatprep.subr.bf16.mxu0 %v1167_v45 }
  0x90   :  { %1033 = vmatpush3.bf16.msra.mxu0 %v1168_v46 }
  0x91   :  { %1034 = vmatprep.subr.bf16.mxu0 %v1169_v47 }
  0x94   :  { %1035 = vmatpush3.bf16.msra.mxu0 %v1170_v48 }
 0x137   :  { %v379_v27 = vpop.f32.mrf.mxu0 }
 0x138   :  { %v380_v34 = vadd.f32 %v379_v27, %v178_v29 }
 0x139   :  { %v381_v30 = vpop.f32.mrf.mxu0 }
 0x13a   :  { %v382_v32 = vadd.f32 %v381_v30, %v182_v28  ;;  %v388_v40 = vmax.f32 %v380_v34, 0.0 }
 0x13b   :  { %v383_v31 = vpop.f32.mrf.mxu0 }
 0x13c   :  { %v384_v33 = vadd.f32 %v383_v31, %v178_v29  ;;  %v389_v38 = vmax.f32 %v382_v32, 0.0  ;;  %v853_v29 = vunpack.c.0.s8 %v852_v26 }
 0x13d   :  { %v385_v35 = vpop.f32.mrf.mxu0 }
 0x13e   :  { %v386_v36 = vadd.f32 %v385_v35, %v182_v28  ;;  %v390_v37 = vmax.f32 %v384_v33, 0.0  ;;  %v856_v33 = vsub.s32 %v853_v29, %v1362_v12 }
 0x140   :  { %v391_v39 = vmax.f32 %v386_v36, 0.0  ;;  %v392_v42 = vpack.c.bf16 %v390_v37, %v388_v40 }
 0x142   :  { %v393_v41 = vpack.c.bf16 %v391_v39, %v389_v38 }
 0x144   :  { %630 = vmatprep.mubr.bf16.mxu1 %v393_v41 }
 0x145   :  { %631 = vmatmul.mubr.bf16.vlgmr.msra.gmra.mxu1 %v392_v42 }
 0x205   :  { %v632_v50 = vpop.f32.mrf.mxu1 }
 0x206   :  { %v633_v57 = vadd.f32 %v632_v50, %v431_v52 }
 0x207   :  { %v634_v53 = vpop.f32.mrf.mxu1 }
 0x208   :  { %v635_v55 = vadd.f32 %v634_v53, %v435_v51  ;;  %v641_v63 = vmax.f32 %v633_v57, 0.0 }
 0x209   :  { %v636_v54 = vpop.f32.mrf.mxu1 }
 0x20a   :  { %v637_v56 = vadd.f32 %v636_v54, %v431_v52  ;;  %v642_v61 = vmax.f32 %v635_v55, 0.0 }
 0x20b   :  { %v638_v58 = vpop.f32.mrf.mxu1 }
 0x20c   :  { %v639_v59 = vadd.f32 %v638_v58, %v435_v51  ;;  %v643_v60 = vmax.f32 %v637_v56, 0.0 }
 0x20e   :  { %v644_v62 = vmax.f32 %v639_v59, 0.0  ;;  %v645_v1 = vpack.c.bf16 %v643_v60, %v641_v63 }
 0x210   :  { %v646_v0 = vpack.c.bf16 %v644_v62, %v642_v61 }
 0x212   :  { %814 = vmatprep.mubr.bf16.mxu0 %v646_v0 }
 0x213   :  { %815 = vmatmul.mubr.bf16.vlgmr.msra.gmra.mxu0 %v645_v1 }
 0x2d3   :  { %v1036_v2 = vpop.f32.mrf.mxu0 }
 0x2d5   :  { %v1037_v4 = vpop.f32.mrf.mxu0 }
 0x2d6   :  { %v1038_v6 = vadd.f32 %v1037_v4, %v1036_v2 }
 0x2d7   :  { %v1039_v7 = vpop.f32.mrf.mxu0 }
 0x2d8   :  { %v817_v8 = vadd.f32 %v1038_v6, %v998_v5 }
 0x2d9   :  { %v1040_v10 = vpop.f32.mrf.mxu0 }
 0x2da   :  { %v1041_v11 = vadd.f32 %v1040_v10, %v1039_v7  ;;  %v826_v13 = vsel %vm825_vm0, %v817_v8, -inf }
 0x2db   :  { %828 = vmax.xlane.f32.xlu0 %v826_v13 }
 0x2dc   :  { %v820_v14 = vadd.f32 %v1041_v11, %v998_v5 }
 0x2de   :  { %v827_v15 = vsel %vm825_vm0, %v820_v14, -inf }
 0x2df   :  { %830 = vmax.xlane.f32.xlu0 %v827_v15 }
 0x364   :  { %v829_v16 = vpop.xlane.xlu0 %828 }
 0x365   :  { %v832_v17 = vsub.f32 %v826_v13, %v829_v16 }
 0x367   :  { %v834_v18 = vmul.f32 1.442695, %v832_v17 }
 0x368   :  { %v831_v9 = vpop.xlane.xlu0 %830 }
 0x369   :  { %v833_v19 = vsub.f32 %v827_v15, %v831_v9  ;;  %1171 = vpow2.f32 %v834_v18 }
 0x36b   :  { %v836_v20 = vmul.f32 1.442695, %v833_v19 }
 0x36d   :  { %1173 = vpow2.f32 %v836_v20 }
 0x376   :  { %v1172_v21 = vpop.eup %1171 }
 0x377   :  { %838 = vadd.xlane.f32.xlu1 %v1172_v21 }
 0x37a   :  { %v1174_v22 = vpop.eup %1173 }
 0x37b   :  { %840 = vadd.xlane.f32.xlu1 %v1174_v22 }
 0x400   :  { %v839_v23 = vpop.xlane.xlu1 %838 }
 0x401   :  { %1175 = vlog2.f32 %v839_v23 }
 0x404   :  { %v841_v24 = vpop.xlane.xlu1 %840 }
 0x405   :  { %1177 = vlog2.f32 %v841_v24 }
 0x40e   :  { %v1176_v27 = vpop.eup %1175 }
 0x40f   :  { %v843_v28 = vmul.f32 0.6931472, %v1176_v27 }
 0x411   :  { %v846_v32 = vsub.f32 %v832_v17, %v843_v28 }
 0x412   :  { %v1178_v30 = vpop.eup %1177 }
 0x413   :  { %v845_v31 = vmul.f32 0.6931472, %v1178_v30 }
 0x415   :  { %v847_v34 = vsub.f32 %v833_v19, %v845_v31 }
 0x417   :  { %v848_v35 = vpack.c.bf16 %v847_v34, %v846_v32  ;;  %v1015_v36 = vpack.c.bf16 %v847_v34, %v847_v34 }
 0x419   :  { %v857_v37 = vrot.slane %v848_v35, %v856_v33  ;;  %v864_v38 = vrot.slane %v1015_v36, %v856_v33 }
 0x41b   :  { %v865_v39 = vcombine.high %v857_v37, %v857_v37  ;;  %v866_v40 = vcombine.high %v864_v38, %v864_v38  ;;  %v873_v41 = vrot.slane %v857_v37, %v856_v33  ;;  %v880_v42 = vrot.slane %v864_v38, %v856_v33  ;;  %1016 = vst.sshfl [vmem:[#allocation10] sm:$0x1 pattern:$0x73625140] %v857_v37 }
 0x41c   :  { %1018 = vst.sshfl [vmem:[#allocation10 + $0x4] sm:$0x1 pattern:$0x73625140] %v864_v38 }
 0x41d   :  { %v887_v43 = vrot.slane %v865_v39, %v856_v33  ;;  %v894_v44 = vrot.slane %v866_v40, %v856_v33  ;;  %v895_v45 = vcombine.high %v873_v41, %v873_v41  ;;  %v896_v46 = vcombine.high %v880_v42, %v880_v42  ;;  %1017 = vst.sshfl [vmem:[#allocation10 + $0x1] sm:$0x1 pattern:$0x73625140] %v865_v39 }
 0x41e   :  { %1019 = vst.sshfl [vmem:[#allocation10 + $0x5] sm:$0x1 pattern:$0x73625140] %v866_v40 }
 0x41f   :  { %v897_v47 = vcombine.high %v887_v43, %v887_v43  ;;  %v898_v48 = vcombine.high %v894_v44, %v894_v44  ;;  %909 = vst [vmem:[#allocation10 + $0x2] sm:$0x1] %v895_v45  ;;  %913 = vst [vmem:[#allocation10 + $0x6] sm:$0x1] %v896_v46 }
 0x421   :  { %910 = vst [vmem:[#allocation10 + $0x3] sm:$0x1] %v897_v47  ;;  %914 = vst [vmem:[#allocation10 + $0x7] sm:$0x1] %v898_v48 }
 0x422   :  { %919 = vsyncadd [#allocation4], 112  ;;  %s1300_s6 = smov [#allocation10]  }
 0x423   :  { %s920_s26 = sshll.u32 %s1300_s6, 4  ;;  %s921_s26 = int_to_ptr.vmem [resolvable:$true] %s920_s26 }
 0x424   :  { %s1263_s27 = scalar_lea.vmem %s921_s26, 16  ;;  %s1267_s28 = scalar_lea.vmem %s921_s26, 128 }
 0x425   :  { %p1264_p6 = scmp.ne.s32.totalorder %s921_s26, %s1263_s27  ;;  %p1268_p7 = scmp.lt.s32.totalorder %s921_s26, %s921_s26 }
 0x426   :  { %p1269_p8 = scmp.lt.s32.totalorder %s1267_s28, %s1263_s27 }
 0x428   :  { %p1270_p9 = por %p1269_p8, %p1268_p7 }
 0x42a   :  { %p1271_p10 = pnand %p1270_p9, %p1264_p6 }
 0x42c   :  { %1274 = shalt.err (!%p1271_p10)
}
 0x42d   :  { %s1301_s29 = smov 16   ;;  %s1302_s30 = smov 1  }
 0x42e   :  { %926 = dma.vmem_to_hbm [thread:$0]  %s921_s26, 16, %s1403_s7, [#allocation4], %s1301_s29, %s1301_s29, %s1302_s30  }
 0x42f   :  { %1289 = dma.done.wait [#allocation4], 128  }
 0x430   :  { %1290 = vsyncadd [#allocation4], 4294967168 }
 0x431   :  { %930 = vsyncpa [#allocation3], 1 }
 0x432   :  { %931 = vsyncpa [#allocation6], 1 }
 0x433   :  { %932 = vsyncpa [#allocation9], 1 }
 0x434   :  { %933 = vsyncpa [#allocation4], 1 }

// kernel: tpu_custom_call.1
= control target key start
LH: loop header
LB: loop body
LE: loop exit
PB: predicated region body
PF: predicated region fallthrough
CT: control target
= control target key end

     0   :  { %12 = vsyncpa [#allocation3], 0  ;;  %s1396_s0 = inlined_call_operand.hbm [shape: f32[2,256], index: 0, kind: input, shape index: {}]   ;;  %s1397_s1 = inlined_call_operand.hbm [shape: bf16[256,256], index: 1, kind: input, shape index: {}]   ;;  %s1398_s2 = inlined_call_operand.vmem [shape: f32[1,256], index: 2, kind: input, shape index: {}]   ;;  %s1399_s3 = inlined_call_operand.hbm [shape: bf16[256,256], index: 3, kind: input, shape index: {}]   ;;  %s1400_s4 = inlined_call_operand.vmem [shape: f32[1,256], index: 4, kind: input, shape index: {}]   ;;  %s1401_s5 = inlined_call_operand.hbm [shape: bf16[256,128], index: 5, kind: input, shape index: {}]   ;;  %s1402_s6 = inlined_call_operand.vmem [shape: f32[1,128], index: 6, kind: input, shape index: {}]   ;;  %s1403_s7 = inlined_call_operand.hbm [shape: bf16[2,128], index: 7, kind: output, shape index: {}]  }
   0x1   :  { %13 = vsyncpa [#allocation6], 0 }
   0x2   :  { %14 = vsyncpa [#allocation9], 0 }
   0x3   :  { %15 = vsyncpa [#allocation4], 0 }
   0x4   :  { %20 = vsyncadd [#allocation3], 448  ;;  %s1291_s24 = smov [#allocation5]  }
   0x5   :  { %s33_s25 = sshll.u32 %s1291_s24, 4  ;;  %s34_s25 = int_to_ptr.vmem [resolvable:$true] %s33_s25 }
   0x6   :  { %s1191_s26 = scalar_lea.vmem %s34_s25, 4096  ;;  %p1196_p1 = scmp.lt.s32.totalorder %s34_s25, %s34_s25 }
   0x7   :  { %p1192_p0 = scmp.ne.s32.totalorder %s34_s25, %s1191_s26  ;;  %p1197_p2 = scmp.lt.s32.totalorder %s1191_s26, %s1191_s26 }
   0x9   :  { %p1198_p3 = por %p1197_p2, %p1196_p1 }
   0xb   :  { %p1199_p4 = pnand %p1198_p3, %p1192_p0 }
   0xd   :  { %1202 = shalt.err (!%p1199_p4)
}
   0xe   :  { %s1292_s27 = smov 128   ;;  %s1293_s28 = smov 8  }
   0xf   :  { %39 = dma.hbm_to_vmem [thread:$0]  %s1397_s1, 4096, %s34_s25, [#allocation6], %s1292_s27, %s1292_s27, %s1293_s28  }
  0x10   :  { %s1294_s8 = smov [#allocation2]  }
  0x11   :  { %s21_s9 = sshll.u32 %s1294_s8, 4  ;;  %s22_s9 = int_to_ptr.vmem [resolvable:$true] %s21_s9 }
  0x12   :  { %s1211_s10 = scalar_lea.vmem %s22_s9, 64  ;;  %s1215_s11 = scalar_lea.vmem %s22_s9, 512 }
  0x13   :  { %p1212_p5 = scmp.ne.s32.totalorder %s22_s9, %s1211_s10  ;;  %p1216_p6 = scmp.lt.s32.totalorder %s22_s9, %s22_s9 }
  0x14   :  { %p1217_p7 = scmp.lt.s32.totalorder %s1215_s11, %s1211_s10 }
  0x16   :  { %p1218_p8 = por %p1217_p7, %p1216_p6 }
  0x18   :  { %p1219_p9 = pnand %p1218_p8, %p1212_p5 }
  0x1a   :  { %1222 = shalt.err (!%p1219_p9)
}
  0x1b   :  { %s1295_s12 = smov 64   ;;  %s1296_s13 = smov 4  }
  0x1c   :  { %27 = dma.hbm_to_vmem [thread:$0]  %s1396_s0, 64, %s22_s9, [#allocation3], %s1295_s12, %s1295_s12, %s1296_s13  }
  0x1d   :  { %s1297_s16 = smov [#allocation7]   ;;  %s1298_s1 = smov [#allocation8]  }
  0x1e   :  { %s47_s17 = sshll.u32 %s1297_s16, 4  ;;  %s61_s18 = sshll.u32 %s1298_s1, 4  ;;  %s48_s17 = int_to_ptr.vmem [resolvable:$true] %s47_s17  ;;  %s62_s18 = int_to_ptr.vmem [resolvable:$true] %s61_s18 }
  0x1f   :  { %s1231_s19 = scalar_lea.vmem %s48_s17, 4096  ;;  %p1236_p11 = scmp.lt.s32.totalorder %s48_s17, %s48_s17 }
  0x20   :  { %p1232_p10 = scmp.ne.s32.totalorder %s48_s17, %s1231_s19  ;;  %p1237_p12 = scmp.lt.s32.totalorder %s1231_s19, %s1231_s19 }
  0x22   :  { %p1238_p13 = por %p1237_p12, %p1236_p11 }
  0x24   :  { %p1239_p0 = pnand %p1238_p13, %p1232_p10 }
  0x26   :  { %1242 = shalt.err (!%p1239_p0)
}
  0x27   :  { %53 = dma.hbm_to_vmem [thread:$0]  %s1399_s3, 4096, %s48_s17, [#allocation6], %s1292_s27, %s1292_s27, %s1293_s28  }
  0x28   :  { %s1251_s0 = scalar_lea.vmem %s62_s18, 2048  ;;  %p1256_p2 = scmp.lt.s32.totalorder %s62_s18, %s62_s18 }
  0x29   :  { %p1252_p1 = scmp.ne.s32.totalorder %s62_s18, %s1251_s0  ;;  %p1257_p3 = scmp.lt.s32.totalorder %s1251_s0, %s1251_s0 }
  0x2b   :  { %p1258_p4 = por %p1257_p3, %p1256_p2 }
  0x2d   :  { %p1259_p5 = pnand %p1258_p4, %p1252_p1 }
  0x2f   :  { %1262 = shalt.err (!%p1259_p5)
}
  0x30   :  { %67 = dma.hbm_to_vmem [thread:$0]  %s1401_s5, 2048, %s62_s18, [#allocation9], %s1295_s12, %s1295_s12, %s1296_s13  }
  0x31   :  { %1283 = dma.done.wait [#allocation3], 512  }
  0x32   :  { %1284 = vsyncadd [#allocation3], 4294966784 }
  0x33   :  { %1285 = dma.done.wait [#allocation6], 8192  }
  0x34   :  { %1286 = vsyncadd [#allocation6], 4294959104 }
  0x35   :  { %1287 = dma.done.wait [#allocation9], 2048  }
  0x36   :  { %1288 = vsyncadd [#allocation9], 4294965248  ;;  %v1055_v0 = vld [vmem:[#allocation5 + $0x74] ss:$8 sps:$4 sm:$0xff]   ;;  %v1057_v1 = vld [vmem:[#allocation5 + $0x70] ss:$8 sps:$4 sm:$0xff]   ;;  %v104_v9 = vlaneseq }
  0x37   :  { %345 = vmatprep.subr.bf16.mxu0 %v1055_v0  ;;  %v1058_v2 = vld [vmem:[#allocation5 + $0x64] ss:$8 sps:$4 sm:$0xff]   ;;  %v1060_v3 = vld [vmem:[#allocation5 + $0x60] ss:$8 sps:$4 sm:$0xff]   ;;  %v1061_v4 = vld [vmem:[#allocation5 + $0x54] ss:$8 sps:$4 sm:$0xff]  }
  0x38   :  { %346 = vmatpush1.bf16.msra.mxu0 %v1057_v1  ;;  %v1063_v5 = vld [vmem:[#allocation5 + $0x50] ss:$8 sps:$4 sm:$0xff]   ;;  %v1064_v6 = vld [vmem:[#allocation5 + $0x44] ss:$8 sps:$4 sm:$0xff]   ;;  %v1066_v7 = vld [vmem:[#allocation5 + $0x40] ss:$8 sps:$4 sm:$0xff]  }
  0x39   :  { %347 = vmatprep.subr.bf16.mxu0 %v1058_v2  ;;  %v1067_v8 = vld [vmem:[#allocation5 + $0x34] ss:$8 sps:$4 sm:$0xff]   ;;  %v1069_v10 = vld [vmem:[#allocation5 + $0x30] ss:$8 sps:$4 sm:$0xff]   ;;  %v1070_v11 = vld [vmem:[#allocation5 + $0x24] ss:$8 sps:$4 sm:$0xff]  }
  0x3a   :  { %v1362_v12 = vshrl.u32 %v104_v9, 7  ;;  %v1072_v13 = vld [vmem:[#allocation5 + $0x20] ss:$8 sps:$4 sm:$0xff]   ;;  %v1073_v14 = vld [vmem:[#allocation5 + $0x14] ss:$8 sps:$4 sm:$0xff]  }
  0x3b   :  { %v1075_v15 = vld [vmem:[#allocation5 + $0x10] ss:$8 sps:$4 sm:$0xff]   ;;  %v1076_v16 = vld [vmem:[#allocation5 + $0x4] ss:$8 sps:$4 sm:$0xff]   ;;  %v1107_v21 = vld [vmem:[#allocation7 + $0x74] ss:$8 sps:$4 sm:$0xff]  }
  0x3c   :  { %348 = vmatpush1.bf16.msra.mxu0 %v1060_v3  ;;  %v1364_v17 = vld.sshfl [vmem:[#allocation2] sm:$0xff pattern:$0x76325410]  ;;  %v1366_v18 = vld.sshfl [vmem:[#allocation2 + $0x8] sm:$0xff pattern:$0x76325410]  ;;  %598 = vmatprep.subr.bf16.mxu1 %v1107_v21 }
  0x3d   :  { %349 = vmatprep.subr.bf16.mxu0 %v1061_v4  ;;  %v1368_v19 = vld.sshfl [vmem:[#allocation2 + $0x10] sm:$0xff pattern:$0x76325410]  ;;  %v1370_v20 = vld.sshfl [vmem:[#allocation2 + $0x18] sm:$0xff pattern:$0x76325410]  ;;  %v116_v26 = vcombine.high %v1364_v17, %v1366_v18  ;;  %v115_v58 = vcombine.low %v1364_v17, %v1366_v18 }
  0x3e   :  { %v1109_v22 = vld [vmem:[#allocation7 + $0x70] ss:$8 sps:$4 sm:$0xff]   ;;  %v1078_v23 = vld [vmem:[#allocation5] ss:$8 sps:$4 sm:$0xff]   ;;  %v1110_v24 = vld [vmem:[#allocation7 + $0x64] ss:$8 sps:$4 sm:$0xff]   ;;  %v134_v27 = vcombine.high %v1368_v19, %v1370_v20  ;;  %v133_v59 = vcombine.low %v1368_v19, %v1370_v20 }
  0x3f   :  { %v1079_v25 = vld [vmem:[#allocation5 + $0xf4] ss:$8 sps:$4 sm:$0xff]   ;;  %599 = vmatpush1.bf16.msra.mxu1 %v1109_v22  ;;  %v1112_v28 = vld [vmem:[#allocation7 + $0x60] ss:$8 sps:$4 sm:$0xff]   ;;  %v1081_v30 = vld [vmem:[#allocation5 + $0xf0] ss:$8 sps:$4 sm:$0xff]  }
  0x40   :  { %350 = vmatpush1.bf16.msra.mxu0 %v1063_v5  ;;  %600 = vmatprep.subr.bf16.mxu1 %v1110_v24  ;;  %v1113_v29 = vld [vmem:[#allocation7 + $0x54] ss:$8 sps:$4 sm:$0xff]   ;;  %v140_v31 = vpack.c.bf16 %v134_v27, %v116_v26  ;;  %v1082_v32 = vld [vmem:[#allocation5 + $0xe4] ss:$8 sps:$4 sm:$0xff]   ;;  %v1115_v33 = vld [vmem:[#allocation7 + $0x50] ss:$8 sps:$4 sm:$0xff]   ;;  %v139_v63 = vpack.c.bf16 %v133_v59, %v115_v58 }
  0x41   :  { %351 = vmatprep.subr.bf16.mxu0 %v1064_v6  ;;  %v1116_v34 = vld [vmem:[#allocation7 + $0x44] ss:$8 sps:$4 sm:$0xff]   ;;  %v1084_v35 = vld [vmem:[#allocation5 + $0xe0] ss:$8 sps:$4 sm:$0xff]   ;;  %v1085_v36 = vld [vmem:[#allocation5 + $0xd4] ss:$8 sps:$4 sm:$0xff]  }
  0x42   :  { %377 = vmatprep.mubr.bf16.mxu0 %v140_v31  ;;  %v1118_v37 = vld [vmem:[#allocation7 + $0x40] ss:$8 sps:$4 sm:$0xff]   ;;  %v1119_v38 = vld [vmem:[#allocation7 + $0x34] ss:$8 sps:$4 sm:$0xff]   ;;  %v1087_v39 = vld [vmem:[#allocation5 + $0xd0] ss:$8 sps:$4 sm:$0xff]  }
  0x43   :  { %601 = vmatpush1.bf16.msra.mxu1 %v1112_v28  ;;  %v1088_v40 = vld [vmem:[#allocation5 + $0xc4] ss:$8 sps:$4 sm:$0xff]   ;;  %v1121_v41 = vld [vmem:[#allocation7 + $0x30] ss:$8 sps:$4 sm:$0xff]   ;;  %v1090_v42 = vld [vmem:[#allocation5 + $0xc0] ss:$8 sps:$4 sm:$0xff]  }
  0x44   :  { %352 = vmatpush1.bf16.msra.mxu0 %v1066_v7  ;;  %602 = vmatprep.subr.bf16.mxu1 %v1113_v29  ;;  %v1091_v43 = vld [vmem:[#allocation5 + $0xb4] ss:$8 sps:$4 sm:$0xff]   ;;  %v1122_v44 = vld [vmem:[#allocation7 + $0x24] ss:$8 sps:$4 sm:$0xff]   ;;  %v1124_v45 = vld [vmem:[#allocation7 + $0x20] ss:$8 sps:$4 sm:$0xff]  }
  0x45   :  { %353 = vmatprep.subr.bf16.mxu0 %v1067_v8  ;;  %v1125_v46 = vld [vmem:[#allocation7 + $0x14] ss:$8 sps:$4 sm:$0xff]   ;;  %v1093_v47 = vld [vmem:[#allocation5 + $0xb0] ss:$8 sps:$4 sm:$0xff]   ;;  %v1094_v48 = vld [vmem:[#allocation5 + $0xa4] ss:$8 sps:$4 sm:$0xff]  }
  0x46   :  { %v1127_v49 = vld [vmem:[#allocation7 + $0x10] ss:$8 sps:$4 sm:$0xff]   ;;  %v1128_v50 = vld [vmem:[#allocation7 + $0x4] ss:$8 sps:$4 sm:$0xff]   ;;  %v1096_v51 = vld [vmem:[#allocation5 + $0xa0] ss:$8 sps:$4 sm:$0xff]  }
  0x47   :  { %603 = vmatpush1.bf16.msra.mxu1 %v1115_v33  ;;  %v1097_v52 = vld [vmem:[#allocation5 + $0x94] ss:$8 sps:$4 sm:$0xff]   ;;  %v1130_v53 = vld [vmem:[#allocation7] ss:$8 sps:$4 sm:$0xff]   ;;  %v1099_v55 = vld [vmem:[#allocation5 + $0x90] ss:$8 sps:$4 sm:$0xff]  }
  0x48   :  { %354 = vmatpush1.bf16.msra.mxu0 %v1069_v10  ;;  %604 = vmatprep.subr.bf16.mxu1 %v1116_v34  ;;  %v1131_v54 = vld [vmem:[#allocation7 + $0xf4] ss:$8 sps:$4 sm:$0xff]   ;;  %v1100_v56 = vld [vmem:[#allocation5 + $0x84] ss:$8 sps:$4 sm:$0xff]   ;;  %v1133_v57 = vld [vmem:[#allocation7 + $0xf0] ss:$8 sps:$4 sm:$0xff]  }
  0x49   :  { %355 = vmatprep.subr.bf16.mxu0 %v1070_v11  ;;  %v1134_v60 = vld [vmem:[#allocation7 + $0xe4] ss:$8 sps:$4 sm:$0xff]   ;;  %v1102_v61 = vld [vmem:[#allocation5 + $0x80] ss:$8 sps:$4 sm:$0xff]   ;;  %v1137_v0 = vld [vmem:[#allocation7 + $0xd4] ss:$8 sps:$4 sm:$0xff]  }
  0x4a   :  { %v1136_v62 = vld [vmem:[#allocation7 + $0xe0] ss:$8 sps:$4 sm:$0xff]   ;;  %v1139_v1 = vld [vmem:[#allocation7 + $0xd0] ss:$8 sps:$4 sm:$0xff]   ;;  %v1140_v2 = vld [vmem:[#allocation7 + $0xc4] ss:$8 sps:$4 sm:$0xff]  }
  0x4b   :  { %605 = vmatpush1.bf16.msra.mxu1 %v1118_v37  ;;  %v1142_v3 = vld [vmem:[#allocation7 + $0xc0] ss:$8 sps:$4 sm:$0xff]   ;;  %v1143_v4 = vld [vmem:[#allocation7 + $0xb4] ss:$8 sps:$4 sm:$0xff]   ;;  %v1145_v5 = vld [vmem:[#allocation7 + $0xb0] ss:$8 sps:$4 sm:$0xff]  }
  0x4c   :  { %356 = vmatpush1.bf16.msra.mxu0 %v1072_v13  ;;  %606 = vmatprep.subr.bf16.mxu1 %v1119_v38  ;;  %v1146_v6 = vld [vmem:[#allocation7 + $0xa4] ss:$8 sps:$4 sm:$0xff]   ;;  %v1148_v7 = vld [vmem:[#allocation7 + $0xa0] ss:$8 sps:$4 sm:$0xff]   ;;  %v1149_v8 = vld [vmem:[#allocation7 + $0x94] ss:$8 sps:$4 sm:$0xff]  }
  0x4d   :  { %357 = vmatprep.subr.bf16.mxu0 %v1073_v14  ;;  %v1151_v10 = vld [vmem:[#allocation7 + $0x90] ss:$8 sps:$4 sm:$0xff]   ;;  %v1152_v11 = vld [vmem:[#allocation7 + $0x84] ss:$8 sps:$4 sm:$0xff]   ;;  %v1154_v13 = vld [vmem:[#allocation7 + $0x80] ss:$8 sps:$4 sm:$0xff]  }
  0x4e   :  { %v1155_v14 = vld [vmem:[#allocation8 + $0x78] sm:$0xff]   ;;  %v1158_v17 = vld [vmem:[#allocation8 + $0x30] sm:$0xff]   ;;  %v1159_v18 = vld [vmem:[#allocation8 + $0x68] sm:$0xff]   ;;  %v181_v24 = vsub.s32 1, %v1362_v12 }
  0x4f   :  { %607 = vmatpush1.bf16.msra.mxu1 %v1121_v41  ;;  %v1160_v19 = vld [vmem:[#allocation8 + $0x28] sm:$0xff]   ;;  %v1161_v20 = vld [vmem:[#allocation8 + $0x60] sm:$0xff]   ;;  %v1163_v22 = vld [vmem:[#allocation8 + $0x58] sm:$0xff]  }
  0x50   :  { %358 = vmatpush1.bf16.msra.mxu0 %v1075_v15  ;;  %608 = vmatprep.subr.bf16.mxu1 %v1122_v44  ;;  %v1156_v15 = vld [vmem:[#allocation8 + $0x38] sm:$0xff]   ;;  %v1162_v21 = vld [vmem:[#allocation8 + $0x20] sm:$0xff]   ;;  %v1166_v44 = vld [vmem:[#allocation8 + $0x10] sm:$0xff]  }
  0x51   :  { %359 = vmatprep.subr.bf16.mxu0 %v1076_v16  ;;  %v1157_v16 = vld [vmem:[#allocation8 + $0x70] sm:$0xff]   ;;  %v173_v26 = vld [vmem:[%s1398_s2] sm:$0x3] }
  0x52   :  { %v182_v28 = vrot.slane %v173_v26, %v181_v24 }
  0x53   :  { %609 = vmatpush1.bf16.msra.mxu1 %v1124_v45  ;;  %v1167_v45 = vld [vmem:[#allocation8 + $0x48] sm:$0xff]  }
  0x54   :  { %360 = vmatpush1.bf16.msra.mxu0 %v1078_v23  ;;  %610 = vmatprep.subr.bf16.mxu1 %v1125_v46  ;;  %v1164_v23 = vld [vmem:[#allocation8 + $0x18] sm:$0xff]   ;;  %v1168_v46 = vld [vmem:[#allocation8 + $0x8] sm:$0xff]  }
  0x55   :  { %361 = vmatprep.subr.bf16.mxu0 %v1079_v25  ;;  %v177_v25 = vsub.s32 0, %v1362_v12 }
  0x57   :  { %611 = vmatpush1.bf16.msra.mxu1 %v1127_v49  ;;  %v178_v29 = vrot.slane %v173_v26, %v177_v25  ;;  %v426_v49 = vld [vmem:[%s1400_s4] sm:$0x3] }
  0x58   :  { %362 = vmatpush2.bf16.msra.mxu0 %v1081_v30  ;;  %612 = vmatprep.subr.bf16.mxu1 %v1128_v50 }
  0x59   :  { %363 = vmatprep.subr.bf16.mxu0 %v1082_v32 }
  0x5b   :  { %613 = vmatpush1.bf16.msra.mxu1 %v1130_v53 }
  0x5c   :  { %364 = vmatpush2.bf16.msra.mxu0 %v1084_v35  ;;  %614 = vmatprep.subr.bf16.mxu1 %v1131_v54 }
  0x5d   :  { %365 = vmatprep.subr.bf16.mxu0 %v1085_v36 }
  0x5f   :  { %615 = vmatpush2.bf16.msra.mxu1 %v1133_v57 }
  0x60   :  { %366 = vmatpush2.bf16.msra.mxu0 %v1087_v39  ;;  %616 = vmatprep.subr.bf16.mxu1 %v1134_v60 }
  0x61   :  { %367 = vmatprep.subr.bf16.mxu0 %v1088_v40 }
  0x63   :  { %617 = vmatpush2.bf16.msra.mxu1 %v1136_v62 }
  0x64   :  { %368 = vmatpush2.bf16.msra.mxu0 %v1090_v42  ;;  %618 = vmatprep.subr.bf16.mxu1 %v1137_v0 }
  0x65   :  { %369 = vmatprep.subr.bf16.mxu0 %v1091_v43  ;;  %v1165_v43 = vld [vmem:[#allocation8 + $0x50] sm:$0xff]  }
  0x67   :  { %619 = vmatpush2.bf16.msra.mxu1 %v1139_v1 }
  0x68   :  { %370 = vmatpush2.bf16.msra.mxu0 %v1093_v47  ;;  %620 = vmatprep.subr.bf16.mxu1 %v1140_v2  ;;  %v1169_v47 = vld [vmem:[#allocation8 + $0x40] sm:$0xff]  }
  0x69   :  { %371 = vmatprep.subr.bf16.mxu0 %v1094_v48  ;;  %v1170_v48 = vld [vmem:[#allocation8] sm:$0xff]  }
  0x6b   :  { %621 = vmatpush2.bf16.msra.mxu1 %v1142_v3  ;;  %v824_v3 = vand.u32 127, %v104_v9 }
  0x6c   :  { %372 = vmatpush2.bf16.msra.mxu0 %v1096_v51  ;;  %622 = vmatprep.subr.bf16.mxu1 %v1143_v4  ;;  %v435_v51 = vrot.slane %v426_v49, %v181_v24 }
  0x6d   :  { %373 = vmatprep.subr.bf16.mxu0 %v1097_v52  ;;  %v431_v52 = vrot.slane %v426_v49, %v177_v25  ;;  %vm825_vm0 = vcmp.lt.s32.totalorder %v824_v3, 10  ;;  %v1299_v25 = vmov 1966171168  }
  0x6e   :  { %v852_v26 = vunpack.c.l.s4 %v1299_v25 }
  0x6f   :  { %623 = vmatpush2.bf16.msra.mxu1 %v1145_v5  ;;  %v998_v5 = vld [vmem:[%s1402_s6] ss:$0 sm:$0xff] }
  0x70   :  { %374 = vmatpush2.bf16.msra.mxu0 %v1099_v55  ;;  %624 = vmatprep.subr.bf16.mxu1 %v1146_v6 }
  0x71   :  { %375 = vmatprep.subr.bf16.mxu0 %v1100_v56 }
  0x73   :  { %625 = vmatpush2.bf16.msra.mxu1 %v1148_v7 }
  0x74   :  { %376 = vmatpush2.bf16.msra.mxu0 %v1102_v61  ;;  %626 = vmatprep.subr.bf16.mxu1 %v1149_v8 }
  0x75   :  { %1020 = vmatprep.subr.bf16.mxu0 %v1155_v14 }
  0x77   :  { %378 = vmatmul.mubr.bf16.vlgmr.msra.gmra.mxu0 %v139_v63  ;;  %627 = vmatpush2.bf16.msra.mxu1 %v1151_v10 }
  0x78   :  { %628 = vmatprep.subr.bf16.mxu1 %v1152_v11  ;;  %1021 = vmatpush3.bf16.msra.mxu0 %v1156_v15 }
  0x79   :  { %1022 = vmatprep.subr.bf16.mxu0 %v1157_v16 }
  0x7b   :  { %629 = vmatpush2.bf16.msra.mxu1 %v1154_v13 }
  0x7c   :  { %1023 = vmatpush3.bf16.msra.mxu0 %v1158_v17 }
  0x7d   :  { %1024 = vmatprep.subr.bf16.mxu0 %v1159_v18 }
  0x80   :  { %1025 = vmatpush3.bf16.msra.mxu0 %v1160_v19 }
  0x81   :  { %1026 = vmatprep.subr.bf16.mxu0 %v1161_v20 }
  0x84   :  { %1027 = vmatpush3.bf16.msra.mxu0 %v1162_v21 }
  0x85   :  { %1028 = vmatprep.subr.bf16.mxu0 %v1163_v22 }
  0x88   :  { %1029 = vmatpush3.bf16.msra.mxu0 %v1164_v23 }
  0x89   :  { %1030 = vmatprep.subr.bf16.mxu0 %v1165_v43 }
  0x8c   :  { %1031 = vmatpush3.bf16.msra.mxu0 %v1166_v44 }
  0x8d   :  { %1032 = vmatprep.subr.bf16.mxu0 %v1167_v45 }
  0x90   :  { %1033 = vmatpush3.bf16.msra.mxu0 %v1168_v46 }
  0x91   :  { %1034 = vmatprep.subr.bf16.mxu0 %v1169_v47 }
  0x94   :  { %1035 = vmatpush3.bf16.msra.mxu0 %v1170_v48 }
 0x137   :  { %v379_v27 = vpop.f32.mrf.mxu0 }
 0x138   :  { %v380_v34 = vadd.f32 %v379_v27, %v178_v29 }
 0x139   :  { %v381_v30 = vpop.f32.mrf.mxu0 }
 0x13a   :  { %v382_v32 = vadd.f32 %v381_v30, %v182_v28  ;;  %v388_v40 = vmax.f32 %v380_v34, 0.0 }
 0x13b   :  { %v383_v31 = vpop.f32.mrf.mxu0 }
 0x13c   :  { %v384_v33 = vadd.f32 %v383_v31, %v178_v29  ;;  %v389_v38 = vmax.f32 %v382_v32, 0.0  ;;  %v853_v29 = vunpack.c.0.s8 %v852_v26 }
 0x13d   :  { %v385_v35 = vpop.f32.mrf.mxu0 }
 0x13e   :  { %v386_v36 = vadd.f32 %v385_v35, %v182_v28  ;;  %v390_v37 = vmax.f32 %v384_v33, 0.0  ;;  %v856_v33 = vsub.s32 %v853_v29, %v1362_v12 }
 0x140   :  { %v391_v39 = vmax.f32 %v386_v36, 0.0  ;;  %v392_v42 = vpack.c.bf16 %v390_v37, %v388_v40 }
 0x142   :  { %v393_v41 = vpack.c.bf16 %v391_v39, %v389_v38 }
 0x144   :  { %630 = vmatprep.mubr.bf16.mxu1 %v393_v41 }
 0x145   :  { %631 = vmatmul.mubr.bf16.vlgmr.msra.gmra.mxu1 %v392_v42 }
 0x205   :  { %v632_v50 = vpop.f32.mrf.mxu1 }
 0x206   :  { %v633_v57 = vadd.f32 %v632_v50, %v431_v52 }
 0x207   :  { %v634_v53 = vpop.f32.mrf.mxu1 }
 0x208   :  { %v635_v55 = vadd.f32 %v634_v53, %v435_v51  ;;  %v641_v63 = vmax.f32 %v633_v57, 0.0 }
 0x209   :  { %v636_v54 = vpop.f32.mrf.mxu1 }
 0x20a   :  { %v637_v56 = vadd.f32 %v636_v54, %v431_v52  ;;  %v642_v61 = vmax.f32 %v635_v55, 0.0 }
 0x20b   :  { %v638_v58 = vpop.f32.mrf.mxu1 }
 0x20c   :  { %v639_v59 = vadd.f32 %v638_v58, %v435_v51  ;;  %v643_v60 = vmax.f32 %v637_v56, 0.0 }
 0x20e   :  { %v644_v62 = vmax.f32 %v639_v59, 0.0  ;;  %v645_v1 = vpack.c.bf16 %v643_v60, %v641_v63 }
 0x210   :  { %v646_v0 = vpack.c.bf16 %v644_v62, %v642_v61 }
 0x212   :  { %814 = vmatprep.mubr.bf16.mxu0 %v646_v0 }
 0x213   :  { %815 = vmatmul.mubr.bf16.vlgmr.msra.gmra.mxu0 %v645_v1 }
 0x2d3   :  { %v1036_v2 = vpop.f32.mrf.mxu0 }
 0x2d5   :  { %v1037_v4 = vpop.f32.mrf.mxu0 }
 0x2d6   :  { %v1038_v6 = vadd.f32 %v1037_v4, %v1036_v2 }
 0x2d7   :  { %v1039_v7 = vpop.f32.mrf.mxu0 }
 0x2d8   :  { %v817_v8 = vadd.f32 %v1038_v6, %v998_v5 }
 0x2d9   :  { %v1040_v10 = vpop.f32.mrf.mxu0 }
 0x2da   :  { %v1041_v11 = vadd.f32 %v1040_v10, %v1039_v7  ;;  %v826_v13 = vsel %vm825_vm0, %v817_v8, -inf }
 0x2db   :  { %828 = vmax.xlane.f32.xlu0 %v826_v13 }
 0x2dc   :  { %v820_v14 = vadd.f32 %v1041_v11, %v998_v5 }
 0x2de   :  { %v827_v15 = vsel %vm825_vm0, %v820_v14, -inf }
 0x2df   :  { %830 = vmax.xlane.f32.xlu0 %v827_v15 }
 0x364   :  { %v829_v16 = vpop.xlane.xlu0 %828 }
 0x365   :  { %v832_v17 = vsub.f32 %v826_v13, %v829_v16 }
 0x367   :  { %v834_v18 = vmul.f32 1.442695, %v832_v17 }
 0x368   :  { %v831_v9 = vpop.xlane.xlu0 %830 }
 0x369   :  { %v833_v19 = vsub.f32 %v827_v15, %v831_v9  ;;  %1171 = vpow2.f32 %v834_v18 }
 0x36b   :  { %v836_v20 = vmul.f32 1.442695, %v833_v19 }
 0x36d   :  { %1173 = vpow2.f32 %v836_v20 }
 0x376   :  { %v1172_v21 = vpop.eup %1171 }
 0x377   :  { %838 = vadd.xlane.f32.xlu1 %v1172_v21 }
 0x37a   :  { %v1174_v22 = vpop.eup %1173 }
 0x37b   :  { %840 = vadd.xlane.f32.xlu1 %v1174_v22 }
 0x400   :  { %v839_v23 = vpop.xlane.xlu1 %838 }
 0x401   :  { %1175 = vlog2.f32 %v839_v23 }
 0x404   :  { %v841_v24 = vpop.xlane.xlu1 %840 }
 0x405   :  { %1177 = vlog2.f32 %v841_v24 }
 0x40e   :  { %v1176_v27 = vpop.eup %1175 }
 0x40f   :  { %v843_v28 = vmul.f32 0.6931472, %v1176_v27 }
 0x411   :  { %v846_v32 = vsub.f32 %v832_v17, %v843_v28 }
 0x412   :  { %v1178_v30 = vpop.eup %1177 }
 0x413   :  { %v845_v31 = vmul.f32 0.6931472, %v1178_v30 }
 0x415   :  { %v847_v34 = vsub.f32 %v833_v19, %v845_v31 }
 0x417   :  { %v848_v35 = vpack.c.bf16 %v847_v34, %v846_v32  ;;  %v1015_v36 = vpack.c.bf16 %v847_v34, %v847_v34 }
 0x419   :  { %v857_v37 = vrot.slane %v848_v35, %v856_v33  ;;  %v864_v38 = vrot.slane %v1015_v36, %v856_v33 }
 0x41b   :  { %v865_v39 = vcombine.high %v857_v37, %v857_v37  ;;  %v866_v40 = vcombine.high %v864_v38, %v864_v38  ;;  %v873_v41 = vrot.slane %v857_v37, %v856_v33  ;;  %v880_v42 = vrot.slane %v864_v38, %v856_v33  ;;  %1016 = vst.sshfl [vmem:[#allocation10] sm:$0x1 pattern:$0x73625140] %v857_v37 }
 0x41c   :  { %1018 = vst.sshfl [vmem:[#allocation10 + $0x4] sm:$0x1 pattern:$0x73625140] %v864_v38 }
 0x41d   :  { %v887_v43 = vrot.slane %v865_v39, %v856_v33  ;;  %v894_v44 = vrot.slane %v866_v40, %v856_v33  ;;  %v895_v45 = vcombine.high %v873_v41, %v873_v41  ;;  %v896_v46 = vcombine.high %v880_v42, %v880_v42  ;;  %1017 = vst.sshfl [vmem:[#allocation10 + $0x1] sm:$0x1 pattern:$0x73625140] %v865_v39 }
 0x41e   :  { %1019 = vst.sshfl [vmem:[#allocation10 + $0x5] sm:$0x1 pattern:$0x73625140] %v866_v40 }
 0x41f   :  { %v897_v47 = vcombine.high %v887_v43, %v887_v43  ;;  %v898_v48 = vcombine.high %v894_v44, %v894_v44  ;;  %909 = vst [vmem:[#allocation10 + $0x2] sm:$0x1] %v895_v45  ;;  %913 = vst [vmem:[#allocation10 + $0x6] sm:$0x1] %v896_v46 }
 0x421   :  { %910 = vst [vmem:[#allocation10 + $0x3] sm:$0x1] %v897_v47  ;;  %914 = vst [vmem:[#allocation10 + $0x7] sm:$0x1] %v898_v48 }
 0x422   :  { %919 = vsyncadd [#allocation4], 112  ;;  %s1300_s6 = smov [#allocation10]  }
 0x423   :  { %s920_s26 = sshll.u32 %s1300_s6, 4  ;;  %s921_s26 = int_to_ptr.vmem [resolvable:$true] %s920_s26 }
 0x424   :  { %s1263_s27 = scalar_lea.vmem %s921_s26, 16  ;;  %s1267_s28 = scalar_lea.vmem %s921_s26, 128 }
 0x425   :  { %p1264_p6 = scmp.ne.s32.totalorder %s921_s26, %s1263_s27  ;;  %p1268_p7 = scmp.lt.s32.totalorder %s921_s26, %s921_s26 }
 0x426   :  { %p1269_p8 = scmp.lt.s32.totalorder %s1267_s28, %s1263_s27 }
 0x428   :  { %p1270_p9 = por %p1269_p8, %p1268_p7 }
 0x42a   :  { %p1271_p10 = pnand %p1270_p9, %p1264_p6 }
 0x42c   :  { %1274 = shalt.err (!%p1271_p10)
}
 0x42d   :  { %s1301_s29 = smov 16   ;;  %s1302_s30 = smov 1  }
 0x42e   :  { %926 = dma.vmem_to_hbm [thread:$0]  %s921_s26, 16, %s1403_s7, [#allocation4], %s1301_s29, %s1301_s29, %s1302_s30  }
 0x42f   :  { %1289 = dma.done.wait [#allocation4], 128  }
 0x430   :  { %1290 = vsyncadd [#allocation4], 4294967168 }
 0x431   :  { %930 = vsyncpa [#allocation3], 1 }
 0x432   :  { %931 = vsyncpa [#allocation6], 1 }
 0x433   :  { %932 = vsyncpa [#allocation9], 1 }
 0x434   :  { %933 = vsyncpa [#allocation4], 1 }

</bundles_post_ra>
